<compile_context>
chip_gen: v7x
topology: tpu7x:2x2x1
jax: 0.10.0
libtpu: 0.0.40
codegen_flags: <defaults>
</compile_context>

<pallas_src>
import functools

import jax
import jax.numpy as jnp
from jax import lax
from jax.experimental import pallas as pl
from jax.experimental.pallas import tpu as pltpu


# ---------------------------------------------------------------------------
# Fused local-attention kernel: QKV projection + pos-MLP + attn-MLP + softmax
# + weighted aggregation, for one (batch, query-tile) grid cell.
# ---------------------------------------------------------------------------
def _local_attn_kernel(x_ref, xq_ref, posq_ref, posk_ref,
                       wqkv_ref, w1_ref, b1_ref, w2_ref, b2_ref,
                       wa1_ref, ba1_ref, wa2_ref, ba2_ref,
                       out_ref, k_sc, v_sc, pk1_sc, *, dim, ti, mm_dtype):
    n = x_ref.shape[2]
    cdim0 = (((0,), (0,)), ((), ()))   # contract axis 0 of both operands

    # ---- batch-resident terms: K, V projections and p_j @ W1, computed once per
    #      batch (query-tile index 0) and reused across all query tiles. ----
    @pl.when(pl.program_id(1) == 0)
    def _():
        x = x_ref[0]                           # (D, N) channels-first, full point set
        w_k = wqkv_ref[:, dim:2 * dim]         # (D, D)
        w_v = wqkv_ref[:, 2 * dim:]            # (D, D)
        if mm_dtype is not None:
            x = x.astype(mm_dtype)
            w_k, w_v = w_k.astype(mm_dtype), w_v.astype(mm_dtype)
        k_sc[...] = lax.dot_general(x, w_k, cdim0,
                                    preferred_element_type=jnp.float32)   # (N, D)
        v_sc[...] = lax.dot_general(x, w_v, cdim0,
                                    preferred_element_type=jnp.float32)   # (N, D)
        pk = posk_ref[0]                       # (3, N) key positions, lane-dense
        pk1_sc[...] = lax.dot_general(pk, w1_ref[...], cdim0,
                                      preferred_element_type=jnp.float32)  # (N, H1)

    k = k_sc[...]          # (N, D)
    v = v_sc[...]          # (N, D)
    pk1 = pk1_sc[...]      # (N, H1)

    # ---- per-tile Q projection (channels-first x tile; contract over D axis) ----
    x_i = xq_ref[0]                            # (D, TI)
    w_q = wqkv_ref[:, :dim]                    # (D, D)
    if mm_dtype is not None:
        x_i, w_q = x_i.astype(mm_dtype), w_q.astype(mm_dtype)
    q = lax.dot_general(x_i, w_q, cdim0, preferred_element_type=jnp.float32)  # (TI, D)

    # ---- pos-MLP layer 1 via linearity: (p_i - p_j)@W1 + b1 = (p_i@W1 + b1) - p_j@W1 ----
    pq = posq_ref[0]                           # (TI, 3) query positions
    pq1b = jnp.dot(pq, w1_ref[...],
                   preferred_element_type=jnp.float32) + b1_ref[...]          # (TI, H1)
    h1 = jnp.maximum(pq1b[:, None, :] - pk1[None, :, :], 0.0)                 # (TI, N, H1)

    h1dim = w1_ref.shape[1]
    h1_2d = h1.reshape(ti * n, h1dim)
    w2 = w2_ref[...]
    if mm_dtype is not None:
        h1_2d, w2 = h1_2d.astype(mm_dtype), w2.astype(mm_dtype)
    rpe = jnp.dot(h1_2d, w2, preferred_element_type=jnp.float32) + b2_ref[...]  # (TI*N, D)
    rpe3 = rpe.reshape(ti, n, dim)

    # ---- attn-MLP on (q_i - k_j + rel_pos_emb) ----
    s_in = (q[:, None, :] - k[None, :, :] + rpe3).reshape(ti * n, dim)
    wa1, wa2 = wa1_ref[...], wa2_ref[...]
    if mm_dtype is not None:
        s_in, wa1 = s_in.astype(mm_dtype), wa1.astype(mm_dtype)
    h2 = jnp.maximum(
        jnp.dot(s_in, wa1, preferred_element_type=jnp.float32) + ba1_ref[...], 0.0
    )                                                                          # (TI*N, HA)
    if mm_dtype is not None:
        h2, wa2 = h2.astype(mm_dtype), wa2.astype(mm_dtype)
    sim = (jnp.dot(h2, wa2, preferred_element_type=jnp.float32)
           + ba2_ref[...]).reshape(ti, n, dim)                                 # (TI, N, D)

    # ---- softmax over the neighbor axis j (PyTorch dim=-2) ----
    m = jnp.max(sim, axis=1, keepdims=True)
    e = jnp.exp(sim - m)
    denom = jnp.sum(e, axis=1, keepdims=True)
    attn = e * pl.reciprocal(denom, approx=True)     # reciprocal on the EUP slot

    # ---- weighted aggregation of (v + rel_pos_emb) ----
    agg = jnp.sum(attn * (v[None, :, :] + rpe3), axis=1)       # (TI, D)

    # channels-first output: lane dimension is the (large) point axis.
    out_ref[0] = jnp.transpose(agg).astype(out_ref.dtype)      # (D, TI)


# ---------------------------------------------------------------------------
# Query-tile picker: bound the per-tile VMEM working set.
# ---------------------------------------------------------------------------
def _pick_query_tile(n, d, h1, ha, budget_bytes):
    """Largest TI (N itself, or a multiple of 128 dividing N) whose live f32
    intermediates (~(H1 + HA + 6*D) * TI * N floats) fit `budget_bytes`, after
    reserving the batch-resident K/V/pk1 scratch."""
    fixed = (2 * d + h1) * n * 4                      # k_sc + v_sc + pk1_sc
    budget = max(budget_bytes - fixed, budget_bytes // 4)
    per_qrow = (h1 + ha + 6 * d) * 4 * n
    if n <= 128 or per_qrow * n <= budget:
        return n
    cands = [t for t in range(128, n, 128) if n % t == 0]
    for t in sorted(cands, reverse=True):
        if per_qrow * t <= budget:
            return t
    # TODO(synk): also tile the key/j axis (flash-style online softmax) when even
    # TI=128 does not fit (very large N); fall back to the smallest legal tile.
    return cands[0] if cands else n


# ---------------------------------------------------------------------------
# Wrapper
# ---------------------------------------------------------------------------
def local_attention_forward(x_cf, pos, params, *, matmul_dtype=None,
                            vmem_budget_bytes=8 * 1024 * 1024):
    """x_cf: (B, D, N) channels-first, pos: (B, N, 3). Returns (B, D, N)."""
    b, d, n = x_cf.shape

    w_qkv = params["w_qkv"]                  # (D, 3D)
    w1, b1 = params["w1"], params["b1"]      # (3, H1), (1, H1)
    w2, b2 = params["w2"], params["b2"]      # (H1, D), (1, D)
    wa1, ba1 = params["wa1"], params["ba1"]  # (D, HA), (1, HA)
    wa2, ba2 = params["wa2"], params["ba2"]  # (HA, D), (1, D)
    h1_dim, ha = w1.shape[1], wa1.shape[1]

    ti = _pick_query_tile(n, d, h1_dim, ha, vmem_budget_bytes)
    grid = (b, n // ti)

    # Key positions are consumed lane-dense; passing the tiny (B,3,N) transpose
    # avoids any in-kernel relayout of position data (pos itself is negligible).
    pos_t = jnp.transpose(pos, (0, 2, 1))    # (B, 3, N)

    full = lambda a: pl.BlockSpec(a.shape, lambda bb, ii: (0,) * a.ndim)
    kernel = functools.partial(_local_attn_kernel, dim=d, ti=ti,
                               mm_dtype=matmul_dtype)

    return pl.pallas_call(
        kernel,
        out_shape=jax.ShapeDtypeStruct((b, d, n), x_cf.dtype),
        grid_spec=pltpu.PrefetchScalarGridSpec(
            num_scalar_prefetch=0,
            grid=grid,
            in_specs=[
                # x full (keys/values): block index constant over i -> stays
                # resident per batch, no re-DMA across query tiles.
                pl.BlockSpec((1, d, n), lambda bb, ii: (bb, 0, 0)),
                # x query-tile columns (tiny extra DMA, keeps slicing static).
                pl.BlockSpec((1, d, ti), lambda bb, ii: (bb, 0, ii)),
                # query positions (TI, 3), key positions (3, N).
                pl.BlockSpec((1, ti, 3), lambda bb, ii: (bb, ii, 0)),
                pl.BlockSpec((1, 3, n), lambda bb, ii: (bb, 0, 0)),
                full(w_qkv), full(w1), full(b1), full(w2), full(b2),
                full(wa1), full(ba1), full(wa2), full(ba2),
            ],
            out_specs=pl.BlockSpec((1, d, ti), lambda bb, ii: (bb, 0, ii)),
            scratch_shapes=[
                pltpu.VMEM((n, d), jnp.float32),       # K (batch-resident)
                pltpu.VMEM((n, d), jnp.float32),       # V (batch-resident)
                pltpu.VMEM((n, h1_dim), jnp.float32),  # p_j @ W1 (batch-resident)
            ],
        ),
        compiler_params=pltpu.CompilerParams(
            # query-tile axis carries batch-resident scratch -> "arbitrary".
            dimension_semantics=("parallel", "arbitrary"),
            vmem_limit_bytes=32 * 1024 * 1024,
        ),
    )(x_cf, x_cf, pos, pos_t, w_qkv, w1, b1, w2, b2, wa1, ba1, wa2, ba2)


# ---------------------------------------------------------------------------
# Pure-JAX reference (mirrors the PyTorch forward, num_neighbors=None, no mask)
# ---------------------------------------------------------------------------
def local_attention_reference(x_cf, pos, params):
    x = jnp.transpose(x_cf, (0, 2, 1))
    d = x.shape[-1]
    qkv = x @ params["w_qkv"]
    q, k, v = qkv[..., :d], qkv[..., d:2 * d], qkv[..., 2 * d:]
    rel_pos = pos[:, :, None, :] - pos[:, None, :, :]
    rpe = jnp.maximum(rel_pos @ params["w1"] + params["b1"][0], 0.0) @ params["w2"] + params["b2"][0]
    qk_rel = q[:, :, None, :] - k[:, None, :, :]
    vv = v[:, None, :, :] + rpe
    sim = jnp.maximum((qk_rel + rpe) @ params["wa1"] + params["ba1"][0], 0.0) @ params["wa2"] + params["ba2"][0]
    attn = jax.nn.softmax(sim, axis=-2)
    agg = jnp.einsum("bijd,bijd->bid", attn, vv)
    return jnp.transpose(agg, (0, 2, 1))


if __name__ == "__main__":
    B, D, N = 2, 32, 16
    H1 = 64                 # pos_mlp_hidden_dim
    HA = D * 4              # attn_mlp hidden (attn_mlp_hidden_mult=4)

    key = jax.random.PRNGKey(0)
    keys = jax.random.split(key, 12)

    x_cf = jax.random.normal(keys[0], (B, D, N), dtype=jnp.float32)
    pos = jax.random.normal(keys[1], (B, N, 3), dtype=jnp.float32)

    scale = 0.1
    params = {
        "w_qkv": scale * jax.random.normal(keys[2], (D, 3 * D), jnp.float32),
        "w1":  scale * jax.random.normal(keys[3], (3, H1), jnp.float32),
        "b1":  scale * jax.random.normal(keys[4], (1, H1), jnp.float32),
        "w2":  scale * jax.random.normal(keys[5], (H1, D), jnp.float32),
        "b2":  scale * jax.random.normal(keys[6], (1, D), jnp.float32),
        "wa1": scale * jax.random.normal(keys[7], (D, HA), jnp.float32),
        "ba1": scale * jax.random.normal(keys[8], (1, HA), jnp.float32),
        "wa2": scale * jax.random.normal(keys[9], (HA, D), jnp.float32),
        "ba2": scale * jax.random.normal(keys[10], (1, D), jnp.float32),
    }

    out = local_attention_forward(x_cf, pos, params)
    out = jax.block_until_ready(out)

    ref = local_attention_reference(x_cf, pos, params)
    assert out.shape == (B, D, N), out.shape
    # approx reciprocal (EUP) in the softmax relaxes the exact-f32 tolerance.
    max_err = float(jnp.max(jnp.abs(out - ref)))
    assert jnp.allclose(out, ref, atol=2e-3, rtol=2e-3), max_err

    print("KERNEL_OK")
</pallas_src>

<mosaic_0001>
module attributes {stable_mosaic.version = 11 : i64} {
  func.func @_local_attn_kernel(%arg0: i32, %arg1: i32, %arg2: memref<1x32x16xf32, #tpu.memory_space<vmem>>, %arg3: memref<1x32x16xf32, #tpu.memory_space<vmem>>, %arg4: memref<1x16x3xf32, #tpu.memory_space<vmem>>, %arg5: memref<1x3x16xf32, #tpu.memory_space<vmem>>, %arg6: memref<32x96xf32, #tpu.memory_space<vmem>>, %arg7: memref<3x64xf32, #tpu.memory_space<vmem>>, %arg8: memref<1x64xf32, #tpu.memory_space<vmem>>, %arg9: memref<64x32xf32, #tpu.memory_space<vmem>>, %arg10: memref<1x32xf32, #tpu.memory_space<vmem>>, %arg11: memref<32x128xf32, #tpu.memory_space<vmem>>, %arg12: memref<1x128xf32, #tpu.memory_space<vmem>>, %arg13: memref<128x32xf32, #tpu.memory_space<vmem>>, %arg14: memref<1x32xf32, #tpu.memory_space<vmem>>, %arg15: memref<1x32x16xf32, #tpu.memory_space<vmem>>, %arg16: memref<16x32xf32, #tpu.memory_space<vmem>>, %arg17: memref<16x32xf32, #tpu.memory_space<vmem>>, %arg18: memref<16x64xf32, #tpu.memory_space<vmem>>) attributes {dimension_semantics = [#tpu.dimension_semantics<parallel>, #tpu.dimension_semantics<arbitrary>], iteration_bounds = array<i64: 2, 1>, scalar_prefetch = 0 : i64, scratch_operands = 3 : i64, tpu.core_type = #tpu.core_type<tc>, window_params = [{transform_indices = @transform_0, window_bounds = array<i64: 1, 32, 16>}, {transform_indices = @transform_1, window_bounds = array<i64: 1, 32, 16>}, {transform_indices = @transform_2, window_bounds = array<i64: 1, 16, 3>}, {transform_indices = @transform_3, window_bounds = array<i64: 1, 3, 16>}, {pipeline_mode = #tpu.pipeline_mode<synchronous>, transform_indices = @transform_4, window_bounds = array<i64: 32, 96>}, {pipeline_mode = #tpu.pipeline_mode<synchronous>, transform_indices = @transform_5, window_bounds = array<i64: 3, 64>}, {pipeline_mode = #tpu.pipeline_mode<synchronous>, transform_indices = @transform_6, window_bounds = array<i64: 1, 64>}, {pipeline_mode = #tpu.pipeline_mode<synchronous>, transform_indices = @transform_7, window_bounds = array<i64: 64, 32>}, {pipeline_mode = #tpu.pipeline_mode<synchronous>, transform_indices = @transform_8, window_bounds = array<i64: 1, 32>}, {pipeline_mode = #tpu.pipeline_mode<synchronous>, transform_indices = @transform_9, window_bounds = array<i64: 32, 128>}, {pipeline_mode = #tpu.pipeline_mode<synchronous>, transform_indices = @transform_10, window_bounds = array<i64: 1, 128>}, {pipeline_mode = #tpu.pipeline_mode<synchronous>, transform_indices = @transform_11, window_bounds = array<i64: 128, 32>}, {pipeline_mode = #tpu.pipeline_mode<synchronous>, transform_indices = @transform_12, window_bounds = array<i64: 1, 32>}, {transform_indices = @transform_13, window_bounds = array<i64: 1, 32, 16>}]} {
    %c0_i32 = arith.constant 0 : i32
    %0 = arith.cmpi eq, %arg1, %c0_i32 : i32
    %1 = arith.extui %0 : i1 to i32
    %c0_i32_0 = arith.constant 0 : i32
    %2 = arith.cmpi ne, %1, %c0_i32_0 : i32
    scf.if %2 {
      %c0_42 = arith.constant 0 : index
      %c0_43 = arith.constant 0 : index
      %c0_44 = arith.constant 0 : index
      %70 = vector.load %arg2[%c0_42, %c0_43, %c0_44] : memref<1x32x16xf32, #tpu.memory_space<vmem>>, vector<1x32x16xf32>
      %71 = vector.shape_cast %70 : vector<1x32x16xf32> to vector<32x16xf32>
      %c0_45 = arith.constant 0 : index
      %c32 = arith.constant 32 : index
      %72 = vector.load %arg6[%c0_45, %c32] : memref<32x96xf32, #tpu.memory_space<vmem>>, vector<32x32xf32>
      %c0_46 = arith.constant 0 : index
      %c64 = arith.constant 64 : index
      %73 = vector.load %arg6[%c0_46, %c64] : memref<32x96xf32, #tpu.memory_space<vmem>>, vector<32x32xf32>
      %cst_47 = arith.constant dense<0.000000e+00> : vector<16x32xf32>
      %74 = tpu.matmul %71, %72, %cst_47 {dimension_numbers = #tpu.dot_dimension_numbers<[0], [0], [1], [1], [0, 1, 1, 1], [], []>} : vector<32x16xf32>, vector<32x32xf32>, vector<16x32xf32> -> vector<16x32xf32>
      %c0_48 = arith.constant 0 : index
      %c0_49 = arith.constant 0 : index
      %75 = vector.load %arg16[%c0_48, %c0_49] : memref<16x32xf32, #tpu.memory_space<vmem>>, vector<16x32xf32>
      tpu.vector_store %arg16[%c0_48, %c0_49], %74 {strides = array<i32>} : memref<16x32xf32, #tpu.memory_space<vmem>>, vector<16x32xf32>,
      %cst_50 = arith.constant dense<0.000000e+00> : vector<16x32xf32>
      %76 = tpu.matmul %71, %73, %cst_50 {dimension_numbers = #tpu.dot_dimension_numbers<[0], [0], [1], [1], [0, 1, 1, 1], [], []>} : vector<32x16xf32>, vector<32x32xf32>, vector<16x32xf32> -> vector<16x32xf32>
      %c0_51 = arith.constant 0 : index
      %c0_52 = arith.constant 0 : index
      %77 = vector.load %arg17[%c0_51, %c0_52] : memref<16x32xf32, #tpu.memory_space<vmem>>, vector<16x32xf32>
      tpu.vector_store %arg17[%c0_51, %c0_52], %76 {strides = array<i32>} : memref<16x32xf32, #tpu.memory_space<vmem>>, vector<16x32xf32>,
      %c0_53 = arith.constant 0 : index
      %c0_54 = arith.constant 0 : index
      %c0_55 = arith.constant 0 : index
      %78 = vector.load %arg5[%c0_53, %c0_54, %c0_55] : memref<1x3x16xf32, #tpu.memory_space<vmem>>, vector<1x3x16xf32>
      %79 = vector.shape_cast %78 : vector<1x3x16xf32> to vector<3x16xf32>
      %c0_56 = arith.constant 0 : index
      %c0_57 = arith.constant 0 : index
      %80 = vector.load %arg7[%c0_56, %c0_57] : memref<3x64xf32, #tpu.memory_space<vmem>>, vector<3x64xf32>
      %cst_58 = arith.constant dense<0.000000e+00> : vector<16x64xf32>
      %81 = tpu.matmul %79, %80, %cst_58 {dimension_numbers = #tpu.dot_dimension_numbers<[0], [0], [1], [1], [0, 1, 1, 1], [], []>} : vector<3x16xf32>, vector<3x64xf32>, vector<16x64xf32> -> vector<16x64xf32>
      %c0_59 = arith.constant 0 : index
      %c0_60 = arith.constant 0 : index
      %82 = vector.load %arg18[%c0_59, %c0_60] : memref<16x64xf32, #tpu.memory_space<vmem>>, vector<16x64xf32>
      tpu.vector_store %arg18[%c0_59, %c0_60], %81 {strides = array<i32>} : memref<16x64xf32, #tpu.memory_space<vmem>>, vector<16x64xf32>,
    } else {
    }
    %c0 = arith.constant 0 : index
    %c0_1 = arith.constant 0 : index
    %3 = vector.load %arg16[%c0, %c0_1] : memref<16x32xf32, #tpu.memory_space<vmem>>, vector<16x32xf32>
    %c0_2 = arith.constant 0 : index
    %c0_3 = arith.constant 0 : index
    %4 = vector.load %arg17[%c0_2, %c0_3] : memref<16x32xf32, #tpu.memory_space<vmem>>, vector<16x32xf32>
    %c0_4 = arith.constant 0 : index
    %c0_5 = arith.constant 0 : index
    %5 = vector.load %arg18[%c0_4, %c0_5] : memref<16x64xf32, #tpu.memory_space<vmem>>, vector<16x64xf32>
    %c0_6 = arith.constant 0 : index
    %c0_7 = arith.constant 0 : index
    %c0_8 = arith.constant 0 : index
    %6 = vector.load %arg3[%c0_6, %c0_7, %c0_8] : memref<1x32x16xf32, #tpu.memory_space<vmem>>, vector<1x32x16xf32>
    %7 = vector.shape_cast %6 : vector<1x32x16xf32> to vector<32x16xf32>
    %c0_9 = arith.constant 0 : index
    %c0_10 = arith.constant 0 : index
    %8 = vector.load %arg6[%c0_9, %c0_10] : memref<32x96xf32, #tpu.memory_space<vmem>>, vector<32x32xf32>
    %cst = arith.constant dense<0.000000e+00> : vector<16x32xf32>
    %9 = tpu.matmul %7, %8, %cst {dimension_numbers = #tpu.dot_dimension_numbers<[0], [0], [1], [1], [0, 1, 1, 1], [], []>} : vector<32x16xf32>, vector<32x32xf32>, vector<16x32xf32> -> vector<16x32xf32>
    %c0_11 = arith.constant 0 : index
    %c0_12 = arith.constant 0 : index
    %c0_13 = arith.constant 0 : index
    %10 = vector.load %arg4[%c0_11, %c0_12, %c0_13] : memref<1x16x3xf32, #tpu.memory_space<vmem>>, vector<1x16x3xf32>
    %11 = vector.shape_cast %10 : vector<1x16x3xf32> to vector<16x3xf32>
    %c0_14 = arith.constant 0 : index
    %c0_15 = arith.constant 0 : index
    %12 = vector.load %arg7[%c0_14, %c0_15] : memref<3x64xf32, #tpu.memory_space<vmem>>, vector<3x64xf32>
    %cst_16 = arith.constant dense<0.000000e+00> : vector<16x64xf32>
    %13 = tpu.matmul %11, %12, %cst_16 {dimension_numbers = #tpu.dot_dimension_numbers<[1], [0], [0], [1], [0, 0, 1, 1], [], []>} : vector<16x3xf32>, vector<3x64xf32>, vector<16x64xf32> -> vector<16x64xf32>
    %c0_17 = arith.constant 0 : index
    %c0_18 = arith.constant 0 : index
    %14 = vector.load %arg8[%c0_17, %c0_18] : memref<1x64xf32, #tpu.memory_space<vmem>>, vector<1x64xf32>
    %15 = vector.broadcast %14 : vector<1x64xf32> to vector<16x64xf32>
    %16 = arith.addf %13, %15 : vector<16x64xf32>
    %17 = vector.shape_cast %16 : vector<16x64xf32> to vector<16x1x64xf32>
    %18 = vector.shape_cast %5 : vector<16x64xf32> to vector<1x16x64xf32>
    %19 = vector.broadcast %17 : vector<16x1x64xf32> to vector<16x16x64xf32>
    %20 = vector.broadcast %18 : vector<1x16x64xf32> to vector<16x16x64xf32>
    %21 = arith.subf %19, %20 : vector<16x16x64xf32>
    %cst_19 = arith.constant 0.000000e+00 : f32
    %22 = vector.broadcast %cst_19 : f32 to vector<16x16x64xf32>
    %23 = arith.maximumf %21, %22 : vector<16x16x64xf32>
    %24 = vector.shape_cast %23 : vector<16x16x64xf32> to vector<256x64xf32>
    %c0_20 = arith.constant 0 : index
    %c0_21 = arith.constant 0 : index
    %25 = vector.load %arg9[%c0_20, %c0_21] : memref<64x32xf32, #tpu.memory_space<vmem>>, vector<64x32xf32>
    %cst_22 = arith.constant dense<0.000000e+00> : vector<256x32xf32>
    %26 = tpu.matmul %24, %25, %cst_22 {dimension_numbers = #tpu.dot_dimension_numbers<[1], [0], [0], [1], [0, 0, 1, 1], [], []>} : vector<256x64xf32>, vector<64x32xf32>, vector<256x32xf32> -> vector<256x32xf32>
    %c0_23 = arith.constant 0 : index
    %c0_24 = arith.constant 0 : index
    %27 = vector.load %arg10[%c0_23, %c0_24] : memref<1x32xf32, #tpu.memory_space<vmem>>, vector<1x32xf32>
    %28 = vector.broadcast %27 : vector<1x32xf32> to vector<256x32xf32>
    %29 = arith.addf %26, %28 : vector<256x32xf32>
    %30 = vector.shape_cast %29 : vector<256x32xf32> to vector<16x16x32xf32>
    %31 = vector.shape_cast %9 : vector<16x32xf32> to vector<16x1x32xf32>
    %32 = vector.shape_cast %3 : vector<16x32xf32> to vector<1x16x32xf32>
    %33 = vector.broadcast %31 : vector<16x1x32xf32> to vector<16x16x32xf32>
    %34 = vector.broadcast %32 : vector<1x16x32xf32> to vector<16x16x32xf32>
    %35 = arith.subf %33, %34 : vector<16x16x32xf32>
    %36 = arith.addf %35, %30 : vector<16x16x32xf32>
    %37 = vector.shape_cast %36 : vector<16x16x32xf32> to vector<256x32xf32>
    %c0_25 = arith.constant 0 : index
    %c0_26 = arith.constant 0 : index
    %38 = vector.load %arg11[%c0_25, %c0_26] : memref<32x128xf32, #tpu.memory_space<vmem>>, vector<32x128xf32>
    %c0_27 = arith.constant 0 : index
    %c0_28 = arith.constant 0 : index
    %39 = vector.load %arg13[%c0_27, %c0_28] : memref<128x32xf32, #tpu.memory_space<vmem>>, vector<128x32xf32>
    %cst_29 = arith.constant dense<0.000000e+00> : vector<256x128xf32>
    %40 = tpu.matmul %37, %38, %cst_29 {dimension_numbers = #tpu.dot_dimension_numbers<[1], [0], [0], [1], [0, 0, 1, 1], [], []>} : vector<256x32xf32>, vector<32x128xf32>, vector<256x128xf32> -> vector<256x128xf32>
    %c0_30 = arith.constant 0 : index
    %c0_31 = arith.constant 0 : index
    %41 = vector.load %arg12[%c0_30, %c0_31] : memref<1x128xf32, #tpu.memory_space<vmem>>, vector<1x128xf32>
    %42 = vector.broadcast %41 : vector<1x128xf32> to vector<256x128xf32>
    %43 = arith.addf %40, %42 : vector<256x128xf32>
    %cst_32 = arith.constant 0.000000e+00 : f32
    %44 = vector.broadcast %cst_32 : f32 to vector<256x128xf32>
    %45 = arith.maximumf %43, %44 : vector<256x128xf32>
    %cst_33 = arith.constant dense<0.000000e+00> : vector<256x32xf32>
    %46 = tpu.matmul %45, %39, %cst_33 {dimension_numbers = #tpu.dot_dimension_numbers<[1], [0], [0], [1], [0, 0, 1, 1], [], []>} : vector<256x128xf32>, vector<128x32xf32>, vector<256x32xf32> -> vector<256x32xf32>
    %c0_34 = arith.constant 0 : index
    %c0_35 = arith.constant 0 : index
    %47 = vector.load %arg14[%c0_34, %c0_35] : memref<1x32xf32, #tpu.memory_space<vmem>>, vector<1x32xf32>
    %48 = vector.broadcast %47 : vector<1x32xf32> to vector<256x32xf32>
    %49 = arith.addf %46, %48 : vector<256x32xf32>
    %50 = vector.shape_cast %49 : vector<256x32xf32> to vector<16x16x32xf32>
    %cst_36 = arith.constant dense<0xFF800000> : vector<16x32xf32>
    %51 = vector.multi_reduction <maximumf>, %50, %cst_36 [1] : vector<16x16x32xf32> to vector<16x32xf32>
    %52 = vector.shape_cast %51 : vector<16x32xf32> to vector<16x1x32xf32>
    %53 = vector.broadcast %52 : vector<16x1x32xf32> to vector<16x16x32xf32>
    %54 = arith.subf %50, %53 : vector<16x16x32xf32>
    %55 = math.exp %54 : vector<16x16x32xf32>
    %cst_37 = arith.constant dense<0.000000e+00> : vector<16x32xf32>
    %56 = vector.multi_reduction <add>, %55, %cst_37 [1] : vector<16x16x32xf32> to vector<16x32xf32>
    %57 = vector.shape_cast %56 : vector<16x32xf32> to vector<16x1x32xf32>
    %58 = tpu.reciprocal %57 {approx = true} : vector<16x1x32xf32> -> vector<16x1x32xf32>
    %59 = vector.broadcast %58 : vector<16x1x32xf32> to vector<16x16x32xf32>
    %60 = arith.mulf %55, %59 : vector<16x16x32xf32>
    %61 = vector.shape_cast %4 : vector<16x32xf32> to vector<1x16x32xf32>
    %62 = vector.broadcast %61 : vector<1x16x32xf32> to vector<16x16x32xf32>
    %63 = arith.addf %62, %30 : vector<16x16x32xf32>
    %64 = arith.mulf %60, %63 : vector<16x16x32xf32>
    %cst_38 = arith.constant dense<0.000000e+00> : vector<16x32xf32>
    %65 = vector.multi_reduction <add>, %64, %cst_38 [1] : vector<16x16x32xf32> to vector<16x32xf32>
    %66 = tpu.transpose %65, [1, 0] : vector<16x32xf32> -> vector<32x16xf32>
    %c0_39 = arith.constant 0 : index
    %c0_40 = arith.constant 0 : index
    %c0_41 = arith.constant 0 : index
    %67 = vector.load %arg15[%c0_39, %c0_40, %c0_41] : memref<1x32x16xf32, #tpu.memory_space<vmem>>, vector<1x32x16xf32>
    %68 = vector.shape_cast %67 : vector<1x32x16xf32> to vector<32x16xf32>
    %69 = vector.shape_cast %66 : vector<32x16xf32> to vector<1x32x16xf32>
    tpu.vector_store %arg15[%c0_39, %c0_40, %c0_41], %69 {strides = array<i32>} : memref<1x32x16xf32, #tpu.memory_space<vmem>>, vector<1x32x16xf32>,
    return
  }
  func.func @transform_0(%arg0: i32, %arg1: i32) -> (i32, i32, i32) {
    %c0_i32 = arith.constant 0 : i32
    %c0_i32_0 = arith.constant 0 : i32
    %c0_i32_1 = arith.constant 0 : i32
    return %arg0, %c0_i32, %c0_i32_0 : i32, i32, i32
  }
  func.func @transform_1(%arg0: i32, %arg1: i32) -> (i32, i32, i32) {
    %c0_i32 = arith.constant 0 : i32
    %c0_i32_0 = arith.constant 0 : i32
    return %arg0, %c0_i32, %arg1 : i32, i32, i32
  }
  func.func @transform_2(%arg0: i32, %arg1: i32) -> (i32, i32, i32) {
    %c0_i32 = arith.constant 0 : i32
    %c0_i32_0 = arith.constant 0 : i32
    return %arg0, %arg1, %c0_i32 : i32, i32, i32
  }
  func.func @transform_3(%arg0: i32, %arg1: i32) -> (i32, i32, i32) {
    %c0_i32 = arith.constant 0 : i32
    %c0_i32_0 = arith.constant 0 : i32
    %c0_i32_1 = arith.constant 0 : i32
    return %arg0, %c0_i32, %c0_i32_0 : i32, i32, i32
  }
  func.func @transform_4(%arg0: i32, %arg1: i32) -> (i32, i32) {
    %c0_i32 = arith.constant 0 : i32
    %c0_i32_0 = arith.constant 0 : i32
    %c0_i32_1 = arith.constant 0 : i32
    return %c0_i32, %c0_i32_0 : i32, i32
  }
  func.func @transform_5(%arg0: i32, %arg1: i32) -> (i32, i32) {
    %c0_i32 = arith.constant 0 : i32
    %c0_i32_0 = arith.constant 0 : i32
    %c0_i32_1 = arith.constant 0 : i32
    return %c0_i32, %c0_i32_0 : i32, i32
  }
  func.func @transform_6(%arg0: i32, %arg1: i32) -> (i32, i32) {
    %c0_i32 = arith.constant 0 : i32
    %c0_i32_0 = arith.constant 0 : i32
    %c0_i32_1 = arith.constant 0 : i32
    return %c0_i32, %c0_i32_0 : i32, i32
  }
  func.func @transform_7(%arg0: i32, %arg1: i32) -> (i32, i32) {
    %c0_i32 = arith.constant 0 : i32
    %c0_i32_0 = arith.constant 0 : i32
    %c0_i32_1 = arith.constant 0 : i32
    return %c0_i32, %c0_i32_0 : i32, i32
  }
  func.func @transform_8(%arg0: i32, %arg1: i32) -> (i32, i32) {
    %c0_i32 = arith.constant 0 : i32
    %c0_i32_0 = arith.constant 0 : i32
    %c0_i32_1 = arith.constant 0 : i32
    return %c0_i32, %c0_i32_0 : i32, i32
  }
  func.func @transform_9(%arg0: i32, %arg1: i32) -> (i32, i32) {
    %c0_i32 = arith.constant 0 : i32
    %c0_i32_0 = arith.constant 0 : i32
    %c0_i32_1 = arith.constant 0 : i32
    return %c0_i32, %c0_i32_0 : i32, i32
  }
  func.func @transform_10(%arg0: i32, %arg1: i32) -> (i32, i32) {
    %c0_i32 = arith.constant 0 : i32
    %c0_i32_0 = arith.constant 0 : i32
    %c0_i32_1 = arith.constant 0 : i32
    return %c0_i32, %c0_i32_0 : i32, i32
  }
  func.func @transform_11(%arg0: i32, %arg1: i32) -> (i32, i32) {
    %c0_i32 = arith.constant 0 : i32
    %c0_i32_0 = arith.constant 0 : i32
    %c0_i32_1 = arith.constant 0 : i32
    return %c0_i32, %c0_i32_0 : i32, i32
  }
  func.func @transform_12(%arg0: i32, %arg1: i32) -> (i32, i32) {
    %c0_i32 = arith.constant 0 : i32
    %c0_i32_0 = arith.constant 0 : i32
    %c0_i32_1 = arith.constant 0 : i32
    return %c0_i32, %c0_i32_0 : i32, i32
  }
  func.func @transform_13(%arg0: i32, %arg1: i32) -> (i32, i32, i32) {
    %c0_i32 = arith.constant 0 : i32
    %c0_i32_0 = arith.constant 0 : i32
    return %arg0, %c0_i32, %arg1 : i32, i32, i32
  }
}

</mosaic_0001>

<bundles_post_ra>
// kernel: tpu_custom_call.1
= control target key start
LH: loop header
LB: loop body
LE: loop exit
PB: predicated region body
PF: predicated region fallthrough
CT: control target
= control target key end

     0   :  { %s4221_s25 = smov 0   ;;  %s4223_s26 = smov 0   ;;  %s5553_s0 = inlined_call_operand.vmem [shape: f32[2,32,16], index: 0, kind: input, shape index: {}]   ;;  %s5554_s1 = inlined_call_operand.vmem [shape: f32[2,32,16], index: 1, kind: input, shape index: {}]   ;;  %s5555_s2 = inlined_call_operand.vmem [shape: f32[2,16,3], index: 2, kind: input, shape index: {}]   ;;  %s5556_s3 = inlined_call_operand.vmem [shape: f32[2,3,16], index: 3, kind: input, shape index: {}]   ;;  %s5557_s4 = inlined_call_operand.vmem [shape: f32[32,96], index: 4, kind: input, shape index: {}]   ;;  %s5558_s5 = inlined_call_operand.vmem [shape: f32[3,64], index: 5, kind: input, shape index: {}]   ;;  %s5559_s6 = inlined_call_operand.vmem [shape: f32[1,64], index: 6, kind: input, shape index: {}]   ;;  %s5560_s7 = inlined_call_operand.vmem [shape: f32[64,32], index: 7, kind: input, shape index: {}]   ;;  %s5561_s8 = inlined_call_operand.vmem [shape: f32[1,32], index: 8, kind: input, shape index: {}]   ;;  %s5562_s9 = inlined_call_operand.vmem [shape: f32[32,128], index: 9, kind: input, shape index: {}]   ;;  %s5563_s10 = inlined_call_operand.vmem [shape: f32[1,128], index: 10, kind: input, shape index: {}]   ;;  %s5564_s11 = inlined_call_operand.vmem [shape: f32[128,32], index: 11, kind: input, shape index: {}]   ;;  %s5565_s12 = inlined_call_operand.vmem [shape: f32[1,32], index: 12, kind: input, shape index: {}]   ;;  %s5566_s13 = inlined_call_operand.vmem [shape: f32[2,32,16], index: 13, kind: output, shape index: {}]  }
   0x1   :  { %s4225_s27 = smov 0  }
   0x2 LB: > { %s35_s28 = sadd.s32 1, %s4142_s26  ;;  %p3407_p0 = scmp.ge.s32.totalorder %s4146_s27, 1  ;;  %s4146_s27 = sphi %s4225_s27, %s23_s27   ;;  %s4142_s26 = sphi %s4223_s26, %s5616_s26   ;;  %s4138_s25 = sphi %s4221_s25, %s5615_s25  }
   0x3   : > { %p37_p1 = scmp.ge.s32.totalorder %s35_s28, 2  ;;  %p442_p2 = scmp.lt.s32.totalorder %s4146_s27, 3 }
   0x5   : > { %s5618_s28 = smov (%p37_p1, %s35_s28), 0  ;;  %p443_p3 = pnand %p3407_p0, %p442_p2 }
   0x7   : > { %446 = sbr.rel (%p443_p3) target bundleno = 1388 (0x56c), region = 72 }
   0xe   : > { %v4242_v0 = vld [vmem:[%s5557_s4] sm:$0xff]  ;;  %v4247_v1 = vld [vmem:[%s5557_s4 + $0x8] sm:$0xff]  ;;  %v4252_v2 = vld [vmem:[%s5557_s4 + $0x10] sm:$0xff]  ;;  %p510_p4 = scmp.lt.s32.totalorder %s4138_s25, 1  ;;  %s4148_s20 = smov 96   ;;  %vm819_vm0 = vcmask 1042432  }
   0xf   : > { %v4016_v3 = vpack.i.bf16 %v4247_v1, %v4242_v0  ;;  %v4259_v4 = vld [vmem:[%s5557_s4 + $0x18] sm:$0xff]  ;;  %s4149_s16 = smov 64   ;;  %v779_v23 = vld [vmem:[%s5558_s5] sm:$0x7]  ;;  %vm605_vm1 = vcmask 261120   ;;  %vm812_vm2 = vcmask 23552   ;;  %v3910_v39 = vpack.c.bf16 %v4247_v1, %v4242_v0 }
  0x10   : > { %s5620_s25 = smov (!%p510_p4, %s4138_s25), 1  ;;  %v4011_v5 = vpack.i.bf16 %v4259_v4, %v4252_v2  ;;  %v1031_v26 = vld [vmem:[%s5558_s5] sm:$0x7]  ;;  %v3914_v40 = vpack.c.bf16 %v4259_v4, %v4252_v2  ;;  %v1370_v44 = vld [vmem:[%s5560_s7 + $0x8] sm:$0xff]  ;;  %v1371_v46 = vld [vmem:[%s5560_s7 + $0x10] sm:$0xff]  ;;  %v1131_v1 = vlaneseq  ;;  %vm898_vm3 = vcmask 523264  }
  0x11   : > { %4007 = vrot.lane.b32.xlu0 %v4016_v3, %s4148_s20  ;;  %s4266_s21 = sshll.u32 %s5620_s25, 5  ;;  %s3414_s29 = sshll.u32 %s5620_s25, 2  ;;  %v1369_v43 = vld [vmem:[%s5560_s7] sm:$0xff]  ;;  %v1372_v47 = vld [vmem:[%s5560_s7 + $0x18] sm:$0xff]  ;;  %v1374_v50 = vld [vmem:[%s5560_s7 + $0x28] sm:$0xff]  ;;  %vm3218_vm4 = vcmask 1041409  }
  0x12   : > { %s514_s24 = scalar_lea.vmem %s5553_s0, %s4266_s21  ;;  %s536_s15 = scalar_lea.vmem %s5556_s3, %s3414_s29  ;;  %v3918_v45 = vpack.c.bf16 %v1370_v44, %v1369_v43  ;;  %v3922_v48 = vpack.c.bf16 %v1372_v47, %v1371_v46  ;;  %v1373_v49 = vld [vmem:[%s5560_s7 + $0x20] sm:$0xff]  ;;  %v1375_v52 = vld [vmem:[%s5560_s7 + $0x30] sm:$0xff]  ;;  %v1376_v53 = vld [vmem:[%s5560_s7 + $0x38] sm:$0xff]  ;;  %v4150_v63 = vmov 1966171168   ;;  %v1132_v4 = vshrl.u32 %v1131_v1, 7 }
  0x13   : > { %v549_v6 = vld [vmem:[%s514_s24] sm:$0xff]  ;;  %v550_v7 = vld [vmem:[%s514_s24 + $0x8] sm:$0xff]  ;;  %v551_v8 = vld [vmem:[%s514_s24 + $0x10] sm:$0xff]  ;;  %s522_s19 = scalar_lea.vmem %s5554_s1, %s4266_s21  ;;  %s3501_s29 = sshll.u32 %s5620_s25, 4  ;;  %v3926_v51 = vpack.c.bf16 %v1374_v50, %v1373_v49  ;;  %v3930_v54 = vpack.c.bf16 %v1376_v53, %v1375_v52  ;;  %v1129_v0 = vunpack.c.l.s4 %v4150_v63  ;;  %vm3220_vm5 = vcmask 1042434  }
  0x14   : > { %557 = vxpose.xlu1.b32.start [1/4] (short) (narrow) %v549_v6, 16  ;;  %v552_v9 = vld [vmem:[%s514_s24 + $0x18] sm:$0xff]  ;;  %v778_v10 = vld [vmem:[%s536_s15] sm:$0x7]  ;;  %v908_v12 = vld [vmem:[%s522_s19 + $0x8] sm:$0xff]  ;;  %s531_s15 = scalar_lea.vmem %s5555_s2, %s3501_s29  ;;  %vm3222_vm6 = vcmask 1043459  }
  0x15   : > { %4012 = vrot.lane.b32.xlu0 %v4011_v5, %s4148_s20  ;;  %v907_v11 = vld [vmem:[%s522_s19] sm:$0xff]  ;;  %v909_v13 = vld [vmem:[%s522_s19 + $0x10] sm:$0xff]  ;;  %v910_v14 = vld [vmem:[%s522_s19 + $0x18] sm:$0xff]  ;;  %vm3224_vm7 = vcmask 1044484   ;;  %vm3226_vm8 = vcmask 1045509   ;;  %vm3228_vm9 = vcmask 1046534  }
  0x16   : > { %v1029_v32 = vld [vmem:[%s531_s15] sm:$0xff]  ;;  %v1030_v34 = vld [vmem:[%s531_s15 + $0x8] sm:$0xff]  ;;  %v1952_v57 = vld [vmem:[%s5562_s9 + $0x10] sm:$0xff]  ;;  %vm3230_vm10 = vcmask 1047559   ;;  %vm3273_vm11 = vcmask 130048  }
  0x17   : > { %v1950_v55 = vld [vmem:[%s5562_s9] sm:$0xff]  ;;  %v1951_v56 = vld [vmem:[%s5562_s9 + $0x8] sm:$0xff]  ;;  %v1953_v59 = vld [vmem:[%s5562_s9 + $0x18] sm:$0xff] }
  0x18   : > { %558 = vxpose.xlu1.b32.cont [2/4] (short) (narrow) %v550_v7, 16  ;;  %v3934_v58 = vpack.c.bf16 %v1951_v56, %v1950_v55  ;;  %v3938_v60 = vpack.c.bf16 %v1953_v59, %v1952_v57  ;;  %v3426_v6 = vld [vmem:[%s5559_s6] ss:$0 sm:$0xff] }
  0x1c   : > { %559 = vxpose.xlu1.b32.cont [3/4] (short) (narrow) %v551_v8, 16 }
  0x20   : > { %560 = vxpose.xlu1.b32.end [4/4] (short) (narrow) %v552_v9, 16 }
  0x33   : > { %780 = vxpose.xlu0.b32.start.end [1/1] (short) (narrow) %v778_v10, 16 }
  0x3e   : > { %4017 = vrot.lane.b32.xlu1 %v4016_v3, %s4149_s16  ;;  %v1130_v3 = vunpack.c.0.s8 %v1129_v0 }
  0x40   : > { %v4351_v8 = vsub.s32 %v1130_v3, %v1132_v4 }
  0x60   : > { %4022 = vrot.lane.b32.xlu0 %v4011_v5, %s4149_s16  ;;  %s544_s16 = scalar_lea.vmem %s5566_s13, %s4266_s21 }
  0x67   : > { %915 = vxpose.xlu1.b32.start [1/4] (short) (narrow) %v907_v11, 16 }
  0x6b   : > { %916 = vxpose.xlu1.b32.cont [2/4] (short) (narrow) %v908_v12, 16 }
  0x6f   : > { %917 = vxpose.xlu1.b32.cont [3/4] (short) (narrow) %v909_v13, 16 }
  0x73   : > { %918 = vxpose.xlu1.b32.end [4/4] (short) (narrow) %v910_v14, 16  ;;  %v4355_v14 = vsub.s32 0, %v1132_v4 }
  0x83   : > { %v4008_v15 = vpop.permute.xlu0 %4007 }
  0x84   : > { %v4010_v16 = vunpack.i.h.bf16 %v4008_v15  ;;  %v4009_v17 = vunpack.i.l.bf16 %v4008_v15 }
  0x86   : > { %v3894_v18 = vpack.c.bf16 %v4010_v16, %v4009_v17 }
  0x87   : > { %v4013_v19 = vpop.permute.xlu0 %4012 }
  0x88   : > { %v4015_v20 = vunpack.i.h.bf16 %v4013_v19  ;;  %v4014_v21 = vunpack.i.l.bf16 %v4013_v19  ;;  %3895 = vmatprep.subr.bf16.mxu0 %v3894_v18 }
  0x89   : > { %3897 = vmatpush3.bf16.msra.mxu0 %v3894_v18 }
  0x8a   : > { %v3898_v22 = vpack.c.bf16 %v4015_v20, %v4014_v21 }
  0x8c   : > { %3899 = vmatprep.subr.bf16.mxu0 %v3898_v22 }
  0x8d   : > { %3901 = vmatpush3.bf16.msra.mxu0 %v3898_v22 }
  0x8e   : > { %3673 = vmatprep.subr.msk.mxu0 %vm819_vm0, %v779_v23 }
  0x94   : > { %v573_v24 = vpop.trf.xlu1 }
  0x95   : > { %3659 = vmatprep.mubr.msk.f32.mxu0 %vm605_vm1, %v573_v24  ;;  %3670 = vmatprep.mubr.msk.f32.mxu1 %vm605_vm1, %v573_v24 }
  0x98   : > { %v574_v25 = vpop.trf.xlu1 }
  0x99   : > { %3660 = vmatmul.mubr.msk.f32.vlgmr.msra.gmra.mrb[0].mxu0 %vm605_vm1, %v574_v25 }
  0x9a   : > { %3674 = vmatpush3.msk.msra.mxu0 %vm819_vm0, %v779_v23 }
  0x9b   : > { %3689 = vmatprep.subr.msk.mxu0 %vm819_vm0, %v1031_v26 }
  0xb0   : > { %v4018_v27 = vpop.permute.xlu1 %4017 }
  0xb1   : > { %v4020_v28 = vunpack.i.h.bf16 %v4018_v27  ;;  %v4019_v29 = vunpack.i.l.bf16 %v4018_v27 }
  0xb3   : > { %v796_v30 = vpop.trf.xlu0  ;;  %v3902_v31 = vpack.c.bf16 %v4020_v28, %v4019_v29 }
  0xb4   : > { %3675 = vmatprep.mubr.msk.f32.mxu0 %vm812_vm2, %v796_v30 }
  0xb5   : > { %3903 = vmatprep.subr.bf16.mxu1 %v3902_v31 }
  0xb6   : > { %3905 = vmatpush3.bf16.msra.mxu1 %v3902_v31 }
  0xb7   : > { %v797_v33 = vpop.trf.xlu0 }
  0xb8   : > { %3676 = vmatmul.mubr.msk.f32.vlgmr.msra.gmra.mrb[2].mxu0 %vm812_vm2, %v797_v33 }
  0xb9   : > { %3690 = vmatpush3.msk.msra.mxu0 %vm819_vm0, %v1031_v26  ;;  %3691 = vmatprep.mubr.msk.f32.mxu0 %vm812_vm2, %v1029_v32 }
  0xba   : > { %3919 = vmatprep.subr.bf16.mxu0 %v3918_v45 }
  0xbc   : > { %3692 = vmatmul.mubr.msk.f32.vlgmr.msra.gmra.mrb[4].mxu0 %vm812_vm2, %v1030_v34 }
  0xbd   : > { %3921 = vmatpush3.bf16.msra.mxu0 %v3918_v45 }
  0xbe   : > { %3923 = vmatprep.subr.bf16.mxu0 %v3922_v48 }
  0xc1   : > { %3925 = vmatpush3.bf16.msra.mxu0 %v3922_v48 }
  0xc2   : > { %3927 = vmatprep.subr.bf16.mxu0 %v3926_v51 }
  0xc5   : > { %3929 = vmatpush3.bf16.msra.mxu0 %v3926_v51 }
  0xc6   : > { %3931 = vmatprep.subr.bf16.mxu0 %v3930_v54 }
  0xc9   : > { %3933 = vmatpush3.bf16.msra.mxu0 %v3930_v54 }
  0xca   : > { %3935 = vmatprep.subr.bf16.mxu0 %v3934_v58 }
  0xd2   : > { %v4023_v35 = vpop.permute.xlu0 %4022 }
  0xd3   : > { %v4025_v36 = vunpack.i.h.bf16 %v4023_v35  ;;  %v4024_v37 = vunpack.i.l.bf16 %v4023_v35 }
  0xd5   : > { %v3906_v38 = vpack.c.bf16 %v4025_v36, %v4024_v37 }
  0xd7   : > { %3907 = vmatprep.subr.bf16.mxu1 %v3906_v38 }
  0xd8   : > { %3909 = vmatpush3.bf16.msra.mxu1 %v3906_v38 }
  0xd9   : > { %3911 = vmatprep.subr.bf16.mxu1 %v3910_v39 }
  0xdb   : > { %3671 = vmatmul.mubr.msk.f32.vlgmr.msra.gmra.mrb[0].mxu1 %vm605_vm1, %v574_v25 }
  0xdc   : > { %3913 = vmatpush3.bf16.msra.mxu1 %v3910_v39 }
  0xdd   : > { %3915 = vmatprep.subr.bf16.mxu1 %v3914_v40 }
  0xe0   : > { %3917 = vmatpush3.bf16.msra.mxu1 %v3914_v40 }
  0xe1   : > { %3974 = vmatprep.subr.bf16.mxu1 %v3934_v58 }
  0xe7   : > { %v931_v41 = vpop.trf.xlu1 }
  0xe8   : > { %3686 = vmatprep.mubr.msk.f32.mxu1 %vm605_vm1, %v931_v41 }
  0xeb   : > { %v932_v42 = vpop.trf.xlu1 }
  0xec   : > { %3687 = vmatmul.mubr.msk.f32.vlgmr.msra.gmra.mrb[2].mxu1 %vm605_vm1, %v932_v42 }
  0xed   : > { %3976 = vmatpush3.bf16.msra.mxu1 %v3934_v58 }
  0xee   : > { %3975 = vmatprep.subr.bf16.mxu1 %v3938_v60 }
  0xf1   : > { %3977 = vmatpush3.bf16.msra.mxu1 %v3938_v60 }
 0x16c   : > { %v3661_v61 = vpop.f32.mrb[0].mxu0 }
 0x16d   : > { %688 = vst.msk [vmem:[#allocation2 + $0x8] sm:$0xff] %vm605_vm1, %v3661_v61  ;;  %v678_v62 = vpop.f32.mrb[1].mxu0 }
 0x16e   : > { %687 = vst.msk [vmem:[#allocation2] sm:$0xff] %vm605_vm1, %v678_v62 }
 0x18b   : > { %v3677_v2 = vpop.f32.mrb[2].mxu0 }
 0x18c   : > { %900 = vst.msk [vmem:[#allocation4 + $0x8] sm:$0xff] %vm898_vm3, %v3677_v2  ;;  %v889_v5 = vpop.f32.mrb[3].mxu0 }
 0x18d   : > { %899 = vst.msk [vmem:[#allocation4] sm:$0xff] %vm898_vm3, %v889_v5 }
 0x18f   : > { %v3693_v7 = vpop.f32.mrb[4].mxu0 }
 0x190   : > { %v1116_v9 = vpop.f32.mrb[5].mxu0  ;;  %v1122_v42 = vadd.f32 %v3693_v7, %v3426_v6 }
 0x191   : > { %v1117_v10 = vadd.f32 %v3426_v6, %v1116_v9 }
 0x192   : > { %v1183_v49 = vrot.slane %v1122_v42, %v4351_v8  ;;  %v1176_v1 = vcombine.high %v1122_v42, %v1122_v42 }
 0x193   : > { %v1134_v11 = vrot.slane %v1117_v10, %v4351_v8  ;;  %v1127_v15 = vcombine.high %v1117_v10, %v1117_v10  ;;  %v4359_v19 = vld [vmem:[#allocation4 + $0x8] sm:$0xff] }
 0x194   : > { %v4361_v20 = vld [vmem:[#allocation4] sm:$0xff]  ;;  %v1191_v57 = vcombine.high %v1183_v49, %v1183_v49  ;;  %v1199_v61 = vrot.slane %v1183_v49, %v4351_v8  ;;  %v1190_v9 = vrot.slane %v1176_v1, %v4351_v8 }
 0x195   : > { %v1142_v12 = vcombine.high %v1134_v11, %v1134_v11  ;;  %v1150_v13 = vrot.slane %v1134_v11, %v4351_v8  ;;  %v1141_v21 = vrot.slane %v1127_v15, %v4351_v8 }
 0x196   : > { %v1213_v4 = vrot.slane %v1191_v57, %v4351_v8  ;;  %v1260_v5 = vrot.slane %v1199_v61, %v4355_v14  ;;  %v1221_v10 = vcombine.high %v1199_v61, %v1199_v61 }
 0x197   : > { %v1164_v16 = vrot.slane %v1142_v12, %v4351_v8  ;;  %v1172_v17 = vcombine.high %v1150_v13, %v1150_v13  ;;  %v1228_v18 = vrot.slane %v1150_v13, %v4355_v14  ;;  %v1143_v32 = vcombine.high %v1141_v21, %v1141_v21 }
 0x198   : > { %v1157_v33 = vrot.slane %v1141_v21, %v4351_v8  ;;  %v1264_v13 = vrot.slane %v1213_v4, %v4355_v14 }
 0x199   : > { %v1232_v22 = vrot.slane %v1164_v16, %v4355_v14  ;;  %v1174_v23 = vcombine.high %v1164_v16, %v1164_v16  ;;  %v1236_v24 = vrot.slane %v1172_v17, %v4355_v14  ;;  %v1306_v25 = vsub.f32 %v1228_v18, %v4359_v19 }
 0x19a   : > { %v1305_v26 = vsub.f32 %v1228_v18, %v4361_v20  ;;  %v1171_v38 = vrot.slane %v1143_v32, %v4351_v8  ;;  %v1244_v39 = vrot.slane %v1157_v33, %v4355_v14  ;;  %v1173_v45 = vcombine.high %v1157_v33, %v1157_v33 }
 0x19b   : > { %v1307_v27 = vsub.f32 %v1232_v22, %v4361_v20  ;;  %v1338_v28 = vmax.f32 %v1306_v25, 0.0  ;;  %v1308_v31 = vsub.f32 %v1232_v22, %v4359_v19  ;;  %v1309_v34 = vsub.f32 %v1236_v24, %v4361_v20 }
 0x19c   : > { %v1337_v29 = vmax.f32 %v1305_v26, 0.0  ;;  %v1240_v35 = vrot.slane %v1174_v23, %v4355_v14  ;;  %v1310_v37 = vsub.f32 %v1236_v24, %v4359_v19  ;;  %v1313_v47 = vsub.f32 %v1244_v39, %v4361_v20 }
 0x19d   : > { %v1339_v30 = vmax.f32 %v1307_v27, 0.0  ;;  %v1340_v36 = vmax.f32 %v1308_v31, 0.0  ;;  %v1341_v40 = vmax.f32 %v1309_v34, 0.0  ;;  %v1248_v48 = vrot.slane %v1171_v38, %v4355_v14 }
 0x19e   : > { %3710 = vmatprep.mubr.msk.f32.mxu0 %vm898_vm3, %v1337_v29  ;;  %v1311_v41 = vsub.f32 %v1240_v35, %v4361_v20  ;;  %v1342_v43 = vmax.f32 %v1310_v37, 0.0  ;;  %v1312_v44 = vsub.f32 %v1240_v35, %v4359_v19  ;;  %v1314_v51 = vsub.f32 %v1244_v39, %v4359_v19 }
 0x19f   : > { %3711 = vmatmul.mubr.msk.f32.vlgmr.msra.gmra.mrb[6].mxu0 %vm898_vm3, %v1338_v28  ;;  %v1175_v52 = vcombine.high %v1171_v38, %v1171_v38  ;;  %v1345_v53 = vmax.f32 %v1313_v47, 0.0  ;;  %v1315_v54 = vsub.f32 %v1248_v48, %v4361_v20  ;;  %v1252_v55 = vrot.slane %v1173_v45, %v4355_v14 }
 0x1a0   : > { %3713 = vmatprep.mubr.msk.f32.mxu0 %vm898_vm3, %v1339_v30  ;;  %3937 = vmatpush3.bf16.msra.mxu0 %v3934_v58  ;;  %v1343_v46 = vmax.f32 %v1311_v41, 0.0  ;;  %v1344_v50 = vmax.f32 %v1312_v44, 0.0  ;;  %v1346_v58 = vmax.f32 %v1314_v51, 0.0  ;;  %v1321_v16 = vsub.f32 %v1260_v5, %v4361_v20 }
 0x1a1   : > { %3939 = vmatprep.subr.bf16.mxu0 %v3938_v60  ;;  %v1347_v62 = vmax.f32 %v1315_v54, 0.0  ;;  %v1317_v63 = vsub.f32 %v1252_v55, %v4361_v20  ;;  %v1256_v0 = vrot.slane %v1175_v52, %v4355_v14  ;;  %v1318_v3 = vsub.f32 %v1252_v55, %v4359_v19 }
 0x1a2   : > { %v4413_v17 = vrot.slane %v1190_v9, %v4351_v8  ;;  %v1268_v18 = vrot.slane %v1221_v10, %v4355_v14  ;;  %v1322_v22 = vsub.f32 %v1260_v5, %v4359_v19  ;;  %v1192_v23 = vcombine.high %v1190_v9, %v1190_v9 }
 0x1a3   : > { %3714 = vmatmul.mubr.msk.f32.gmra.mrb[8].mxu0 %vm898_vm3, %v1340_v36  ;;  %v1349_v6 = vmax.f32 %v1317_v63, 0.0  ;;  %v1319_v7 = vsub.f32 %v1256_v0, %v4361_v20  ;;  %v1350_v11 = vmax.f32 %v1318_v3, 0.0  ;;  %v1320_v12 = vsub.f32 %v1256_v0, %v4359_v19 }
 0x1a4   : > { %3716 = vmatprep.mubr.msk.f32.mxu0 %vm898_vm3, %v1341_v40  ;;  %3941 = vmatpush3.bf16.msra.mxu0 %v3938_v60  ;;  %v1316_v60 = vsub.f32 %v1248_v48, %v4359_v19  ;;  %v1223_v24 = vcombine.high %v1213_v4, %v1213_v4  ;;  %v1353_v25 = vmax.f32 %v1321_v16, 0.0  ;;  %v1323_v26 = vsub.f32 %v1264_v13, %v4361_v20 }
 0x1a5   : > { %v1351_v15 = vmax.f32 %v1319_v7, 0.0  ;;  %v1352_v21 = vmax.f32 %v1320_v12, 0.0  ;;  %v4422_v27 = vrot.slane %v4413_v17, %v4355_v14  ;;  %v1324_v28 = vsub.f32 %v1264_v13, %v4359_v19 }
 0x1a6   : > { %v1348_v2 = vmax.f32 %v1316_v60, 0.0  ;;  %v1354_v29 = vmax.f32 %v1322_v22, 0.0  ;;  %v1325_v30 = vsub.f32 %v1268_v18, %v4361_v20  ;;  %v4428_v31 = vrot.slane %v1192_v23, %v4351_v8 }
 0x1a7   : > { %3717 = vmatmul.mubr.msk.f32.gmra.mrb[10].mxu0 %vm898_vm3, %v1342_v43  ;;  %v1355_v32 = vmax.f32 %v1323_v26, 0.0  ;;  %v1272_v34 = vrot.slane %v1223_v24, %v4355_v14  ;;  %v1222_v35 = vcombine.high %v4413_v17, %v4413_v17  ;;  %v1326_v39 = vsub.f32 %v1268_v18, %v4359_v19 }
 0x1a8   : > { %3719 = vmatprep.mubr.msk.f32.mxu0 %vm898_vm3, %v1343_v46  ;;  %v1356_v42 = vmax.f32 %v1324_v28, 0.0  ;;  %v1329_v43 = vsub.f32 %v4422_v27, %v4361_v20  ;;  %v1357_v47 = vmax.f32 %v1325_v30, 0.0  ;;  %v1280_v63 = vrot.slane %v4428_v31, %v4355_v14 }
 0x1a9   : > { %v1327_v51 = vsub.f32 %v1272_v34, %v4361_v20  ;;  %v1358_v55 = vmax.f32 %v1326_v39, 0.0  ;;  %v1330_v13 = vsub.f32 %v4422_v27, %v4359_v19  ;;  %v1284_v18 = vrot.slane %v1222_v35, %v4355_v14 }
 0x1aa   : > { %v1361_v16 = vmax.f32 %v1329_v43, 0.0  ;;  %v1331_v17 = vsub.f32 %v1280_v63, %v4361_v20  ;;  %v1332_v28 = vsub.f32 %v1280_v63, %v4359_v19 }
 0x1ab   : > { %3720 = vmatmul.mubr.msk.f32.gmra.mrb[12].mxu0 %vm898_vm3, %v1344_v50  ;;  %v1359_v3 = vmax.f32 %v1327_v51, 0.0  ;;  %v1362_v27 = vmax.f32 %v1330_v13, 0.0 }
 0x1ac   : > { %3722 = vmatprep.mubr.msk.f32.mxu0 %vm898_vm3, %v1345_v53 }
 0x1ae   : > { %v3672_v56 = vpop.f32.mrb[0].mxu1 }
 0x1af   : > { %777 = vst.msk [vmem:[#allocation3 + $0x8] sm:$0xff] %vm605_vm1, %v3672_v56  ;;  %v767_v59 = vpop.f32.mrb[1].mxu1  ;;  %3723 = vmatmul.mubr.msk.f32.gmra.mrb[14].mxu0 %vm898_vm3, %v1346_v58 }
 0x1b0   : > { %776 = vst.msk [vmem:[#allocation3] sm:$0xff] %vm605_vm1, %v767_v59  ;;  %3725 = vmatprep.mubr.msk.f32.mxu0 %vm898_vm3, %v1347_v62  ;;  %v1328_v62 = vsub.f32 %v1272_v34, %v4359_v19 }
 0x1b2   : > { %v1360_v12 = vmax.f32 %v1328_v62, 0.0 }
 0x1b3   : > { %3726 = vmatmul.mubr.msk.f32.gmra.mrb[16].mxu0 %vm898_vm3, %v1348_v2 }
 0x1b4   : > { %3728 = vmatprep.mubr.msk.f32.mxu0 %vm898_vm3, %v1349_v6 }
 0x1b7   : > { %3729 = vmatmul.mubr.msk.f32.gmra.mrb[18].mxu0 %vm898_vm3, %v1350_v11 }
 0x1b8   : > { %3731 = vmatprep.mubr.msk.f32.mxu0 %vm898_vm3, %v1351_v15  ;;  %v1224_v15 = vcombine.high %v4428_v31, %v4428_v31  ;;  %v1363_v31 = vmax.f32 %v1331_v17, 0.0 }
 0x1bb   : > { %3732 = vmatmul.mubr.msk.f32.gmra.mrb[20].mxu0 %vm898_vm3, %v1352_v21 }
 0x1bc   : > { %3734 = vmatprep.mubr.msk.f32.mxu0 %vm898_vm3, %v1353_v25 }
 0x1bf   : > { %v3688_v33 = vpop.f32.mrb[2].mxu1  ;;  %3735 = vmatmul.mubr.msk.f32.gmra.mrb[22].mxu0 %vm898_vm3, %v1354_v29 }
 0x1c0   : > { %v1757_v36 = vcombine.high %v3688_v33, %v3688_v33  ;;  %v1764_v37 = vrot.slane %v3688_v33, %v4351_v8  ;;  %v1020_v38 = vpop.f32.mrb[3].mxu1  ;;  %3737 = vmatprep.mubr.msk.f32.mxu0 %vm898_vm3, %v1355_v32  ;;  %v1333_v32 = vsub.f32 %v1284_v18, %v4361_v20  ;;  %v1288_v33 = vrot.slane %v1224_v15, %v4355_v14 }
 0x1c1   : > { %v1708_v40 = vcombine.high %v1020_v38, %v1020_v38  ;;  %v1715_v41 = vrot.slane %v1020_v38, %v4351_v8 }
 0x1c2   : > { %v1771_v44 = vrot.slane %v1757_v36, %v4351_v8  ;;  %v1772_v45 = vcombine.high %v1764_v37, %v1764_v37  ;;  %v1780_v46 = vrot.slane %v1764_v37, %v4351_v8  ;;  %v1364_v36 = vmax.f32 %v1332_v28, 0.0 }
 0x1c3   : > { %v1722_v48 = vrot.slane %v1708_v40, %v4351_v8  ;;  %v1723_v49 = vcombine.high %v1715_v41, %v1715_v41  ;;  %v1731_v50 = vrot.slane %v1715_v41, %v4351_v8  ;;  %3738 = vmatmul.mubr.msk.f32.gmra.mrb[24].mxu0 %vm898_vm3, %v1356_v42  ;;  %v1334_v37 = vsub.f32 %v1284_v18, %v4359_v19 }
 0x1c4   : > { %v1773_v52 = vcombine.high %v1771_v44, %v1771_v44  ;;  %v1787_v53 = vrot.slane %v1771_v44, %v4351_v8  ;;  %v1794_v54 = vrot.slane %v1772_v45, %v4351_v8  ;;  %v4449_v56 = vrot.slane %v1780_v46, %v4355_v14  ;;  %3740 = vmatprep.mubr.msk.f32.mxu0 %vm898_vm3, %v1357_v47  ;;  %v4541_v47 = vld [vmem:[#allocation2 + $0x8] sm:$0xff] }
 0x1c5   : > { %v1724_v57 = vcombine.high %v1722_v48, %v1722_v48  ;;  %v1738_v58 = vrot.slane %v1722_v48, %v4351_v8  ;;  %v1745_v59 = vrot.slane %v1723_v49, %v4351_v8  ;;  %v1753_v61 = vcombine.high %v1731_v50, %v1731_v50  ;;  %v4543_v49 = vld [vmem:[#allocation2] sm:$0xff] }
 0x1c6   : > { %v1801_v60 = vrot.slane %v1773_v52, %v4351_v8  ;;  %v4460_v2 = vrot.slane %v1731_v50, %v4355_v14  ;;  %v1802_v9 = vcombine.high %v1780_v46, %v1780_v46  ;;  %v1804_v10 = vcombine.high %v1794_v54, %v1794_v54 }
 0x1c7   : > { %v1752_v0 = vrot.slane %v1724_v57, %v4351_v8  ;;  %v1755_v1 = vcombine.high %v1745_v59, %v1745_v59  ;;  %v1754_v4 = vcombine.high %v1738_v58, %v1738_v58  ;;  %3741 = vmatmul.mubr.msk.f32.gmra.mrb[26].mxu0 %vm898_vm3, %v1358_v55  ;;  %v4464_v5 = vrot.slane %v1745_v59, %v4355_v14 }
 0x1c8   : > { %v4467_v6 = vrot.slane %v1753_v61, %v4355_v14  ;;  %v4470_v7 = vrot.slane %v1738_v58, %v4355_v14  ;;  %3743 = vmatprep.mubr.msk.f32.mxu0 %vm898_vm3, %v1359_v3  ;;  %v1803_v23 = vcombine.high %v1787_v53, %v1787_v53  ;;  %v4491_v24 = vrot.slane %v1794_v54, %v4355_v14 }
 0x1c9   : > { %v4474_v8 = vrot.slane %v1755_v1, %v4355_v14  ;;  %v4477_v11 = vrot.slane %v1752_v0, %v4355_v14  ;;  %v4487_v21 = vrot.slane %v1754_v4, %v4355_v14  ;;  %v1756_v22 = vcombine.high %v1752_v0, %v1752_v0 }
 0x1ca   : > { %v4494_v25 = vrot.slane %v1802_v9, %v4355_v14  ;;  %v4497_v26 = vrot.slane %v1804_v10, %v4355_v14  ;;  %v4504_v30 = vrot.slane %v1787_v53, %v4355_v14  ;;  %v4511_v34 = vrot.slane %v1801_v60, %v4355_v14 }
 0x1cb   : > { %3744 = vmatmul.mubr.msk.f32.gmra.mrb[28].mxu0 %vm898_vm3, %v1360_v12  ;;  %v4501_v29 = vrot.slane %v1756_v22, %v4355_v14  ;;  %v4514_v35 = vrot.slane %v1803_v23, %v4355_v14  ;;  %v1805_v38 = vcombine.high %v1801_v60, %v1801_v60  ;;  %v1365_v39 = vmax.f32 %v1333_v32, 0.0 }
 0x1cc   : > { %3746 = vmatprep.mubr.msk.f32.mxu0 %vm898_vm3, %v1361_v16  ;;  %v1335_v40 = vsub.f32 %v1288_v33, %v4361_v20  ;;  %v1366_v42 = vmax.f32 %v1334_v37, 0.0  ;;  %v1336_v43 = vsub.f32 %v1288_v33, %v4359_v19  ;;  %v1954_v20 = vld [vmem:[%s5564_s11] sm:$0xff]  ;;  %v1887_v51 = vsub.f32 %v4460_v2, %v4541_v47 }
 0x1cd   : > { %v4520_v41 = vrot.slane %v1805_v38, %v4355_v14  ;;  %v1955_v14 = vld [vmem:[%s5564_s11 + $0x8] sm:$0xff]  ;;  %v4539_v19 = vld [vmem:[%s5561_s8] ss:$0 sm:$0xff]  ;;  %v1886_v54 = vsub.f32 %v4460_v2, %v4543_v49  ;;  %v1889_v60 = vsub.f32 %v4464_v5, %v4541_v47  ;;  %v1888_v63 = vsub.f32 %v4464_v5, %v4543_v49 }
 0x1ce   : > { %v1367_v44 = vmax.f32 %v1335_v40, 0.0  ;;  %v1368_v45 = vmax.f32 %v1336_v43, 0.0  ;;  %v4533_v46 = vpack.c.bf16 %v1955_v14, %v1954_v20  ;;  %v1891_v4 = vsub.f32 %v4467_v6, %v4541_v47 }
 0x1cf   : > { %3747 = vmatmul.mubr.msk.f32.gmra.mrb[30].mxu0 %vm898_vm3, %v1362_v27  ;;  %v1890_v5 = vsub.f32 %v4467_v6, %v4543_v49  ;;  %v1893_v17 = vsub.f32 %v4474_v8, %v4541_v47  ;;  %v1892_v6 = vsub.f32 %v4474_v8, %v4543_v49  ;;  %v1895_v32 = vsub.f32 %v4470_v7, %v4541_v47 }
 0x1d0   : > { %3749 = vmatprep.mubr.msk.f32.mxu0 %vm898_vm3, %v1363_v31  ;;  %3943 = vmatprep.subr.bf16.mxu1 %v4533_v46  ;;  %v1894_v8 = vsub.f32 %v4470_v7, %v4543_v49  ;;  %v1896_v7 = vsub.f32 %v4477_v11, %v4543_v49 }
 0x1d3   : > { %3750 = vmatmul.mubr.msk.f32.gmra.mrb[32].mxu0 %vm898_vm3, %v1364_v36 }
 0x1d4   : > { %3752 = vmatprep.mubr.msk.f32.mxu0 %vm898_vm3, %v1365_v39 }
 0x1d7   : > { %3753 = vmatmul.mubr.msk.f32.gmra.mrb[34].mxu0 %vm898_vm3, %v1366_v42  ;;  %v1897_v42 = vsub.f32 %v4477_v11, %v4541_v47  ;;  %v1898_v11 = vsub.f32 %v4487_v21, %v4543_v49 }
 0x1d8   : > { %3755 = vmatprep.mubr.msk.f32.mxu0 %vm898_vm3, %v1367_v44 }
 0x1db   : > { %3756 = vmatmul.mubr.msk.f32.gmra.mrb[36].mxu0 %vm898_vm3, %v1368_v45 }
 0x272   : > { %v3712_v48 = vpop.f32.mrb[6].mxu0 }
 0x273   : > { %v4546_v50 = vadd.f32 %v3712_v48, %v4539_v19  ;;  %v1547_v52 = vpop.f32.mrb[7].mxu0 }
 0x274   : > { %v4551_v53 = vadd.f32 %v4539_v19, %v1547_v52 }
 0x275   : > { %v1919_v55 = vadd.f32 %v1887_v51, %v4546_v50  ;;  %v1899_v51 = vsub.f32 %v4487_v21, %v4541_v47  ;;  %v1900_v21 = vsub.f32 %v4501_v29, %v4543_v49 }
 0x276   : > { %v1918_v57 = vadd.f32 %v1886_v54, %v4551_v53  ;;  %v3715_v58 = vpop.f32.mrb[8].mxu0 }
 0x277   : > { %v4558_v59 = vadd.f32 %v3715_v58, %v4539_v19  ;;  %v1557_v61 = vpop.f32.mrb[9].mxu0 }
 0x278   : > { %v4563_v62 = vadd.f32 %v4539_v19, %v1557_v61  ;;  %3766 = vmatprep.mubr.msk.f32.mxu0 %vm605_vm1, %v1918_v57  ;;  %v1901_v61 = vsub.f32 %v4501_v29, %v4541_v47  ;;  %v1903_v29 = vsub.f32 %v4449_v56, %v4541_v47 }
 0x279   : > { %v1921_v0 = vadd.f32 %v1889_v60, %v4558_v59  ;;  %3767 = vmatmul.mubr.msk.f32.vlgmr.msra.gmra.mrb[38].mxu0 %vm605_vm1, %v1919_v55 }
 0x27a   : > { %v1920_v1 = vadd.f32 %v1888_v63, %v4563_v62  ;;  %v3718_v2 = vpop.f32.mrb[10].mxu0 }
 0x27b   : > { %v4572_v3 = vadd.f32 %v3718_v2, %v4539_v19  ;;  %v1567_v9 = vpop.f32.mrb[11].mxu0  ;;  %v1957_v2 = vld [vmem:[%s5564_s11 + $0x18] sm:$0xff] }
 0x27c   : > { %v4577_v10 = vadd.f32 %v4539_v19, %v1567_v9  ;;  %3769 = vmatprep.mubr.msk.f32.mxu0 %vm605_vm1, %v1920_v1  ;;  %v1956_v1 = vld [vmem:[%s5564_s11 + $0x10] sm:$0xff] }
 0x27d   : > { %v1923_v12 = vadd.f32 %v1891_v4, %v4572_v3  ;;  %3770 = vmatmul.mubr.msk.f32.gmra.mrb[40].mxu0 %vm605_vm1, %v1921_v0 }
 0x27e   : > { %v1922_v13 = vadd.f32 %v1890_v5, %v4577_v10  ;;  %v3721_v15 = vpop.f32.mrb[12].mxu0 }
 0x27f   : > { %v4586_v16 = vadd.f32 %v3721_v15, %v4539_v19  ;;  %v1577_v18 = vpop.f32.mrb[13].mxu0  ;;  %v3946_v15 = vpack.c.bf16 %v1957_v2, %v1956_v1 }
 0x280   : > { %v4591_v22 = vadd.f32 %v4539_v19, %v1577_v18  ;;  %3772 = vmatprep.mubr.msk.f32.mxu0 %vm605_vm1, %v1922_v13  ;;  %v1902_v18 = vsub.f32 %v4449_v56, %v4543_v49 }
 0x281   : > { %v1925_v23 = vadd.f32 %v1893_v17, %v4586_v16  ;;  %3773 = vmatmul.mubr.msk.f32.gmra.mrb[42].mxu0 %vm605_vm1, %v1923_v12 }
 0x282   : > { %v1924_v27 = vadd.f32 %v1892_v6, %v4591_v22  ;;  %v3724_v28 = vpop.f32.mrb[14].mxu0  ;;  %v1958_v6 = vld [vmem:[%s5564_s11 + $0x20] sm:$0xff] }
 0x283   : > { %v4600_v31 = vadd.f32 %v3724_v28, %v4539_v19  ;;  %v1587_v33 = vpop.f32.mrb[15].mxu0 }
 0x284   : > { %v4605_v36 = vadd.f32 %v4539_v19, %v1587_v33  ;;  %3775 = vmatprep.mubr.msk.f32.mxu0 %vm605_vm1, %v1924_v27  ;;  %v1905_v33 = vsub.f32 %v4491_v24, %v4541_v47 }
 0x285   : > { %v1927_v37 = vadd.f32 %v1895_v32, %v4600_v31  ;;  %3776 = vmatmul.mubr.msk.f32.gmra.mrb[44].mxu0 %vm605_vm1, %v1925_v23  ;;  %v1959_v23 = vld [vmem:[%s5564_s11 + $0x28] sm:$0xff] }
 0x286   : > { %v1926_v38 = vadd.f32 %v1894_v8, %v4605_v36  ;;  %v3727_v39 = vpop.f32.mrb[16].mxu0 }
 0x287   : > { %v4614_v40 = vadd.f32 %v3727_v39, %v4539_v19  ;;  %v1597_v43 = vpop.f32.mrb[17].mxu0  ;;  %v1904_v39 = vsub.f32 %v4491_v24, %v4543_v49 }
 0x288   : > { %v4619_v44 = vadd.f32 %v4539_v19, %v1597_v43  ;;  %3778 = vmatprep.mubr.msk.f32.mxu0 %vm605_vm1, %v1926_v38 }
 0x289   : > { %v1929_v45 = vadd.f32 %v1897_v42, %v4614_v40  ;;  %3779 = vmatmul.mubr.msk.f32.gmra.mrb[46].mxu0 %vm605_vm1, %v1927_v37  ;;  %v3950_v37 = vpack.c.bf16 %v1959_v23, %v1958_v6  ;;  %v1961_v42 = vld [vmem:[%s5564_s11 + $0x38] sm:$0xff]  ;;  %v1911_v6 = vsub.f32 %v4504_v30, %v4541_v47 }
 0x28a   : > { %v1928_v20 = vadd.f32 %v1896_v7, %v4619_v44  ;;  %v3730_v14 = vpop.f32.mrb[18].mxu0 }
 0x28b   : > { %v4628_v48 = vadd.f32 %v3730_v14, %v4539_v19  ;;  %v1607_v52 = vpop.f32.mrb[19].mxu0 }
 0x28c   : > { %v4633_v54 = vadd.f32 %v4539_v19, %v1607_v52  ;;  %3781 = vmatprep.mubr.msk.f32.mxu0 %vm605_vm1, %v1928_v20  ;;  %v1907_v20 = vsub.f32 %v4494_v25, %v4541_v47 }
 0x28d   : > { %v1931_v55 = vadd.f32 %v1899_v51, %v4628_v48  ;;  %3782 = vmatmul.mubr.msk.f32.gmra.mrb[48].mxu0 %vm605_vm1, %v1929_v45 }
 0x28e   : > { %v1930_v57 = vadd.f32 %v1898_v11, %v4633_v54  ;;  %v3733_v58 = vpop.f32.mrb[20].mxu0  ;;  %v1906_v11 = vsub.f32 %v4494_v25, %v4543_v49 }
 0x28f   : > { %v4642_v60 = vadd.f32 %v3733_v58, %v4539_v19  ;;  %v1617_v63 = vpop.f32.mrb[21].mxu0 }
 0x290   : > { %v4647_v0 = vadd.f32 %v4539_v19, %v1617_v63  ;;  %3784 = vmatprep.mubr.msk.f32.mxu0 %vm605_vm1, %v1930_v57  ;;  %v1963_v57 = vld [vmem:[%s5564_s11 + $0x48] sm:$0xff] }
 0x291   : > { %v1933_v4 = vadd.f32 %v1901_v61, %v4642_v60  ;;  %3785 = vmatmul.mubr.msk.f32.gmra.mrb[50].mxu0 %vm605_vm1, %v1931_v55  ;;  %v1962_v55 = vld [vmem:[%s5564_s11 + $0x40] sm:$0xff] }
 0x292   : > { %v1932_v9 = vadd.f32 %v1900_v21, %v4647_v0  ;;  %v3736_v5 = vpop.f32.mrb[22].mxu0  ;;  %v1909_v21 = vsub.f32 %v4497_v26, %v4541_v47  ;;  %v3958_v2 = vpack.c.bf16 %v1963_v57, %v1962_v55  ;;  %v1915_v57 = vsub.f32 %v4514_v35, %v4541_v47 }
 0x293   : > { %v4662_v12 = vadd.f32 %v3736_v5, %v4539_v19  ;;  %v1627_v13 = vpop.f32.mrb[23].mxu0  ;;  %v1964_v5 = vld [vmem:[%s5564_s11 + $0x50] sm:$0xff] }
 0x294   : > { %v4667_v17 = vadd.f32 %v4539_v19, %v1627_v13  ;;  %3787 = vmatprep.mubr.msk.f32.mxu1 %vm605_vm1, %v1932_v9  ;;  %v1908_v9 = vsub.f32 %v4497_v26, %v4543_v49 }
 0x295   : > { %v1935_v27 = vadd.f32 %v1903_v29, %v4662_v12  ;;  %3788 = vmatmul.mubr.msk.f32.vlgmr.msra.gmra.mrb[4].mxu1 %vm605_vm1, %v1933_v4  ;;  %v1965_v29 = vld [vmem:[%s5564_s11 + $0x58] sm:$0xff] }
 0x296   : > { %v1934_v28 = vadd.f32 %v1902_v18, %v4667_v17  ;;  %v3739_v32 = vpop.f32.mrb[24].mxu0  ;;  %3945 = vmatpush3.bf16.msra.mxu1 %v4533_v46  ;;  %v1960_v46 = vld [vmem:[%s5564_s11 + $0x30] sm:$0xff] }
 0x297   : > { %v4683_v56 = vadd.f32 %v3739_v32, %v4539_v19  ;;  %v1637_v8 = vpop.f32.mrb[25].mxu0  ;;  %3947 = vmatprep.subr.bf16.mxu1 %v3946_v15  ;;  %v3954_v51 = vpack.c.bf16 %v1961_v42, %v1960_v46  ;;  %v1910_v32 = vsub.f32 %v4504_v30, %v4543_v49  ;;  %v1913_v42 = vsub.f32 %v4511_v34, %v4541_v47 }
 0x298   : > { %v4688_v38 = vadd.f32 %v4539_v19, %v1637_v8  ;;  %3790 = vmatprep.mubr.msk.f32.mxu1 %vm605_vm1, %v1934_v28  ;;  %v1967_v8 = vld [vmem:[%s5564_s11 + $0x68] sm:$0xff] }
 0x299   : > { %v1937_v43 = vadd.f32 %v1905_v33, %v4683_v56  ;;  %3791 = vmatmul.mubr.msk.f32.gmra.mrb[6].mxu1 %vm605_vm1, %v1935_v27  ;;  %v3962_v27 = vpack.c.bf16 %v1965_v29, %v1964_v5  ;;  %v1966_v33 = vld [vmem:[%s5564_s11 + $0x60] sm:$0xff] }
 0x29a   : > { %v1936_v7 = vadd.f32 %v1904_v39, %v4688_v38  ;;  %v3742_v45 = vpop.f32.mrb[26].mxu0  ;;  %3949 = vmatpush3.bf16.msra.mxu1 %v3946_v15 }
 0x29b   : > { %v4703_v24 = vadd.f32 %v3742_v45, %v4539_v19  ;;  %v1647_v14 = vpop.f32.mrb[27].mxu0  ;;  %3951 = vmatprep.subr.bf16.mxu1 %v3950_v37 }
 0x29c   : > { %v4708_v52 = vadd.f32 %v4539_v19, %v1647_v14  ;;  %3793 = vmatprep.mubr.msk.f32.mxu1 %vm605_vm1, %v1936_v7  ;;  %v3966_v7 = vpack.c.bf16 %v1967_v8, %v1966_v33 }
 0x29d   : > { %v1939_v58 = vadd.f32 %v1907_v20, %v4703_v24  ;;  %3794 = vmatmul.mubr.msk.f32.gmra.mrb[8].mxu1 %vm605_vm1, %v1937_v43  ;;  %v1912_v20 = vsub.f32 %v4511_v34, %v4543_v49 }
 0x29e   : > { %v1938_v61 = vadd.f32 %v1906_v11, %v4708_v52  ;;  %v3745_v63 = vpop.f32.mrb[28].mxu0  ;;  %3953 = vmatpush3.bf16.msra.mxu1 %v3950_v37 }
 0x29f   : > { %v4723_v25 = vadd.f32 %v3745_v63, %v4539_v19  ;;  %v1657_v1 = vpop.f32.mrb[29].mxu0  ;;  %3955 = vmatprep.subr.bf16.mxu1 %v3954_v51 }
 0x2a0   : > { %v4728_v4 = vadd.f32 %v4539_v19, %v1657_v1  ;;  %3796 = vmatprep.mubr.msk.f32.mxu1 %vm605_vm1, %v1938_v61  ;;  %v1914_v61 = vsub.f32 %v4514_v35, %v4543_v49  ;;  %v1916_v35 = vsub.f32 %v4520_v41, %v4543_v49  ;;  %v4815_v49 = vld [vmem:[%s5563_s10] ss:$0 sm:$0xff] }
 0x2a1   : > { %v1941_v13 = vadd.f32 %v1909_v21, %v4723_v25  ;;  %3797 = vmatmul.mubr.msk.f32.gmra.mrb[10].mxu1 %vm605_vm1, %v1939_v58 }
 0x2a2   : > { %v1940_v15 = vadd.f32 %v1908_v9, %v4728_v4  ;;  %v3748_v18 = vpop.f32.mrb[30].mxu0  ;;  %3957 = vmatpush3.bf16.msra.mxu1 %v3954_v51  ;;  %v1917_v9 = vsub.f32 %v4520_v41, %v4541_v47  ;;  %v1969_v41 = vld [vmem:[%s5564_s11 + $0x78] sm:$0xff] }
 0x2a3   : > { %v4743_v26 = vadd.f32 %v3748_v18, %v4539_v19  ;;  %v1667_v23 = vpop.f32.mrb[31].mxu0  ;;  %3959 = vmatprep.subr.bf16.mxu1 %v3958_v2 }
 0x2a4   : > { %v4748_v28 = vadd.f32 %v4539_v19, %v1667_v23  ;;  %3799 = vmatprep.mubr.msk.f32.mxu1 %vm605_vm1, %v1940_v15 }
 0x2a5   : > { %v1943_v37 = vadd.f32 %v1911_v6, %v4743_v26  ;;  %3800 = vmatmul.mubr.msk.f32.gmra.mrb[12].mxu1 %vm605_vm1, %v1941_v13 }
 0x2a6   : > { %v1942_v39 = vadd.f32 %v1910_v32, %v4748_v28  ;;  %v3751_v46 = vpop.f32.mrb[32].mxu0  ;;  %3961 = vmatpush3.bf16.msra.mxu1 %v3958_v2 }
 0x2a7   : > { %v4763_v30 = vadd.f32 %v3751_v46, %v4539_v19  ;;  %v1677_v43 = vpop.f32.mrb[33].mxu0  ;;  %3963 = vmatprep.subr.bf16.mxu1 %v3962_v27 }
 0x2a8   : > { %v4768_v45 = vadd.f32 %v4539_v19, %v1677_v43  ;;  %3802 = vmatprep.mubr.msk.f32.mxu1 %vm605_vm1, %v1942_v39 }
 0x2a9   : > { %v1945_v14 = vadd.f32 %v1913_v42, %v4763_v30  ;;  %3803 = vmatmul.mubr.msk.f32.gmra.mrb[14].mxu1 %vm605_vm1, %v1943_v37 }
 0x2aa   : > { %v1944_v51 = vadd.f32 %v1912_v20, %v4768_v45  ;;  %v3754_v11 = vpop.f32.mrb[34].mxu0  ;;  %3965 = vmatpush3.bf16.msra.mxu1 %v3962_v27 }
 0x2ab   : > { %v4777_v55 = vadd.f32 %v3754_v11, %v4539_v19  ;;  %v1687_v58 = vpop.f32.mrb[35].mxu0  ;;  %3967 = vmatprep.subr.bf16.mxu1 %v3966_v7 }
 0x2ac   : > { %v4782_v34 = vadd.f32 %v4539_v19, %v1687_v58  ;;  %3805 = vmatprep.mubr.msk.f32.mxu1 %vm605_vm1, %v1944_v51 }
 0x2ad   : > { %v1947_v63 = vadd.f32 %v1915_v57, %v4777_v55  ;;  %3806 = vmatmul.mubr.msk.f32.gmra.mrb[16].mxu1 %vm605_vm1, %v1945_v14 }
 0x2ae   : > { %v1946_v21 = vadd.f32 %v1914_v61, %v4782_v34  ;;  %v3757_v1 = vpop.f32.mrb[36].mxu0  ;;  %3969 = vmatpush3.bf16.msra.mxu1 %v3966_v7 }
 0x2af   : > { %v4791_v2 = vadd.f32 %v3757_v1, %v4539_v19  ;;  %v1697_v5 = vpop.f32.mrb[37].mxu0 }
 0x2b0   : > { %v4796_v29 = vadd.f32 %v4539_v19, %v1697_v5  ;;  %3808 = vmatprep.mubr.msk.f32.mxu1 %vm605_vm1, %v1946_v21  ;;  %v1968_v19 = vld [vmem:[%s5564_s11 + $0x70] sm:$0xff] }
 0x2b1   : > { %5569 = vst [vmem:[#allocation5_spill] sm:$0xff] %v4791_v2  ;;  %v1949_v13 = vadd.f32 %v1917_v9, %v4791_v2  ;;  %3809 = vmatmul.mubr.msk.f32.gmra.mrb[18].mxu1 %vm605_vm1, %v1947_v63  ;;  %v3970_v47 = vpack.c.bf16 %v1969_v41, %v1968_v19 }
 0x2b2   : > { %5570 = vst [vmem:[#allocation6_spill] sm:$0xff] %v4796_v29  ;;  %v1948_v15 = vadd.f32 %v1916_v35, %v4796_v29 }
 0x2b3   : > { %3971 = vmatprep.subr.bf16.mxu1 %v3970_v47 }
 0x2b4   : > { %3811 = vmatprep.mubr.msk.f32.mxu1 %vm605_vm1, %v1948_v15  ;;  %3973 = vmatpush3.bf16.msra.mxu1 %v3970_v47 }
 0x2b5   : > { %3812 = vmatmul.mubr.msk.f32.gmra.mrb[20].mxu1 %vm605_vm1, %v1949_v13 }
 0x34c   : > { %v3768_v18 = vpop.f32.mrb[38].mxu0 }
 0x34d   : > { %v2145_v6 = vadd.f32 %v3768_v18, %v4815_v49  ;;  %v2139_v23 = vpop.f32.mrb[39].mxu0 }
 0x34e   : > { %v2140_v27 = vadd.f32 %v4815_v49, %v2139_v23 }
 0x34f   : > { %v2299_v8 = vmax.f32 %v2145_v6, 0.0 }
 0x350   : > { %v2298_v32 = vmax.f32 %v2140_v27, 0.0  ;;  %v3771_v33 = vpop.f32.mrb[40].mxu0 }
 0x351   : > { %v2155_v37 = vadd.f32 %v3771_v33, %v4815_v49  ;;  %v2149_v39 = vpop.f32.mrb[41].mxu0 }
 0x352   : > { %v2150_v46 = vadd.f32 %v4815_v49, %v2149_v39  ;;  %3846 = vmatprep.mubr.f32.mxu1 %v2298_v32 }
 0x353   : > { %3847 = vmatmul.mubr.f32.vlgmr.msra.gmra.mrb[22].mxu1 %v2299_v8  ;;  %v2301_v7 = vmax.f32 %v2155_v37, 0.0 }
 0x354   : > { %v2300_v42 = vmax.f32 %v2150_v46, 0.0  ;;  %v3774_v43 = vpop.f32.mrb[42].mxu0 }
 0x355   : > { %v2165_v20 = vadd.f32 %v3774_v43, %v4815_v49  ;;  %v2159_v14 = vpop.f32.mrb[43].mxu0 }
 0x356   : > { %v2160_v51 = vadd.f32 %v4815_v49, %v2159_v14  ;;  %3849 = vmatprep.mubr.f32.mxu1 %v2300_v42 }
 0x357   : > { %3850 = vmatmul.mubr.f32.gmra.mrb[24].mxu1 %v2301_v7  ;;  %v2303_v58 = vmax.f32 %v2165_v20, 0.0 }
 0x358   : > { %v2302_v11 = vmax.f32 %v2160_v51, 0.0  ;;  %v3777_v57 = vpop.f32.mrb[44].mxu0 }
 0x359   : > { %v2175_v61 = vadd.f32 %v3777_v57, %v4815_v49  ;;  %v2169_v63 = vpop.f32.mrb[45].mxu0 }
 0x35a   : > { %v2170_v21 = vadd.f32 %v4815_v49, %v2169_v63  ;;  %3852 = vmatprep.mubr.f32.mxu1 %v2302_v11 }
 0x35b   : > { %3853 = vmatmul.mubr.f32.gmra.mrb[26].mxu1 %v2303_v58  ;;  %v2305_v5 = vmax.f32 %v2175_v61, 0.0 }
 0x35c   : > { %v2304_v1 = vmax.f32 %v2170_v21, 0.0  ;;  %v3780_v9 = vpop.f32.mrb[46].mxu0 }
 0x35d   : > { %v2185_v35 = vadd.f32 %v3780_v9, %v4815_v49  ;;  %v2179_v13 = vpop.f32.mrb[47].mxu0 }
 0x35e   : > { %v2180_v15 = vadd.f32 %v4815_v49, %v2179_v13  ;;  %3855 = vmatprep.mubr.f32.mxu1 %v2304_v1 }
 0x35f   : > { %3856 = vmatmul.mubr.f32.gmra.mrb[28].mxu1 %v2305_v5  ;;  %v2307_v47 = vmax.f32 %v2185_v35, 0.0 }
 0x360   : > { %v2306_v19 = vmax.f32 %v2180_v15, 0.0  ;;  %v3783_v41 = vpop.f32.mrb[48].mxu0 }
 0x361   : > { %v2195_v18 = vadd.f32 %v3783_v41, %v4815_v49  ;;  %v2189_v6 = vpop.f32.mrb[49].mxu0 }
 0x362   : > { %v2190_v23 = vadd.f32 %v4815_v49, %v2189_v6  ;;  %3858 = vmatprep.mubr.f32.mxu1 %v2306_v19 }
 0x363   : > { %3859 = vmatmul.mubr.f32.gmra.mrb[30].mxu1 %v2307_v47  ;;  %v2309_v33 = vmax.f32 %v2195_v18, 0.0 }
 0x364   : > { %v2308_v27 = vmax.f32 %v2190_v23, 0.0  ;;  %v3786_v32 = vpop.f32.mrb[50].mxu0 }
 0x365   : > { %v2205_v8 = vadd.f32 %v3786_v32, %v4815_v49  ;;  %v2199_v37 = vpop.f32.mrb[51].mxu0 }
 0x366   : > { %v2200_v39 = vadd.f32 %v4815_v49, %v2199_v37  ;;  %3861 = vmatprep.mubr.f32.mxu1 %v2308_v27 }
 0x367   : > { %3862 = vmatmul.mubr.f32.gmra.mrb[32].mxu1 %v2309_v33  ;;  %v2311_v43 = vmax.f32 %v2205_v8, 0.0 }
 0x368   : > { %v2310_v46 = vmax.f32 %v2200_v39, 0.0  ;;  %v3789_v42 = vpop.f32.mrb[4].mxu1 }
 0x369   : > { %v2215_v7 = vadd.f32 %v3789_v42, %v4815_v49  ;;  %v2209_v20 = vpop.f32.mrb[5].mxu1 }
 0x36a   : > { %v2210_v14 = vadd.f32 %v4815_v49, %v2209_v20  ;;  %3864 = vmatprep.mubr.f32.mxu1 %v2310_v46 }
 0x36b   : > { %3865 = vmatmul.mubr.f32.gmra.mrb[34].mxu1 %v2311_v43  ;;  %v2313_v57 = vmax.f32 %v2215_v7, 0.0 }
 0x36c   : > { %v2312_v51 = vmax.f32 %v2210_v14, 0.0  ;;  %v3792_v11 = vpop.f32.mrb[6].mxu1 }
 0x36d   : > { %v2225_v58 = vadd.f32 %v3792_v11, %v4815_v49  ;;  %v2219_v61 = vpop.f32.mrb[7].mxu1 }
 0x36e   : > { %v2220_v63 = vadd.f32 %v4815_v49, %v2219_v61  ;;  %3867 = vmatprep.mubr.f32.mxu1 %v2312_v51 }
 0x36f   : > { %3868 = vmatmul.mubr.f32.gmra.mrb[36].mxu1 %v2313_v57  ;;  %v2315_v9 = vmax.f32 %v2225_v58, 0.0 }
 0x370   : > { %v2314_v21 = vmax.f32 %v2220_v63, 0.0  ;;  %v3795_v1 = vpop.f32.mrb[8].mxu1 }
 0x371   : > { %v2235_v5 = vadd.f32 %v3795_v1, %v4815_v49  ;;  %v2229_v35 = vpop.f32.mrb[9].mxu1 }
 0x372   : > { %v2230_v13 = vadd.f32 %v4815_v49, %v2229_v35  ;;  %3870 = vmatprep.mubr.f32.mxu1 %v2314_v21 }
 0x373   : > { %3871 = vmatmul.mubr.f32.gmra.mrb[38].mxu1 %v2315_v9  ;;  %v2317_v41 = vmax.f32 %v2235_v5, 0.0 }
 0x374   : > { %v2316_v15 = vmax.f32 %v2230_v13, 0.0  ;;  %v3798_v19 = vpop.f32.mrb[10].mxu1 }
 0x375   : > { %v2245_v47 = vadd.f32 %v3798_v19, %v4815_v49  ;;  %v2239_v18 = vpop.f32.mrb[11].mxu1 }
 0x376   : > { %v2240_v6 = vadd.f32 %v4815_v49, %v2239_v18  ;;  %3873 = vmatprep.mubr.f32.mxu1 %v2316_v15 }
 0x377   : > { %3874 = vmatmul.mubr.f32.gmra.mrb[40].mxu1 %v2317_v41  ;;  %v2319_v32 = vmax.f32 %v2245_v47, 0.0 }
 0x378   : > { %v2318_v23 = vmax.f32 %v2240_v6, 0.0  ;;  %v3801_v27 = vpop.f32.mrb[12].mxu1 }
 0x379   : > { %v2255_v33 = vadd.f32 %v3801_v27, %v4815_v49  ;;  %v2249_v8 = vpop.f32.mrb[13].mxu1  ;;  %v4852_v27 = vld [vmem:[%s5565_s12] ss:$0 sm:$0xff] }
 0x37a   : > { %v2250_v37 = vadd.f32 %v4815_v49, %v2249_v8  ;;  %3876 = vmatprep.mubr.f32.mxu1 %v2318_v23 }
 0x37b   : > { %3877 = vmatmul.mubr.f32.gmra.mrb[42].mxu1 %v2319_v32  ;;  %v2321_v42 = vmax.f32 %v2255_v33, 0.0 }
 0x37c   : > { %v2320_v39 = vmax.f32 %v2250_v37, 0.0  ;;  %v3804_v46 = vpop.f32.mrb[14].mxu1 }
 0x37d   : > { %v2265_v43 = vadd.f32 %v3804_v46, %v4815_v49  ;;  %v2259_v7 = vpop.f32.mrb[15].mxu1 }
 0x37e   : > { %v2260_v20 = vadd.f32 %v4815_v49, %v2259_v7  ;;  %3879 = vmatprep.mubr.f32.mxu1 %v2320_v39  ;;  %v4862_v39 = vld [vmem:[#allocation3] sm:$0xff] }
 0x37f   : > { %3880 = vmatmul.mubr.f32.gmra.mrb[44].mxu1 %v2321_v42  ;;  %v2323_v11 = vmax.f32 %v2265_v43, 0.0  ;;  %v4872_v43 = vadd.f32 %v4551_v53, %v4862_v39 }
 0x380   : > { %v2322_v14 = vmax.f32 %v2260_v20, 0.0  ;;  %v3807_v51 = vpop.f32.mrb[16].mxu1 }
 0x381   : > { %v2275_v57 = vadd.f32 %v3807_v51, %v4815_v49  ;;  %v2269_v58 = vpop.f32.mrb[17].mxu1  ;;  %v4882_v51 = vadd.f32 %v4563_v62, %v4862_v39 }
 0x382   : > { %v2270_v61 = vadd.f32 %v4815_v49, %v2269_v58  ;;  %3882 = vmatprep.mubr.f32.mxu1 %v2322_v14  ;;  %v4893_v58 = vadd.f32 %v4577_v10, %v4862_v39 }
 0x383   : > { %3883 = vmatmul.mubr.f32.gmra.mrb[46].mxu1 %v2323_v11  ;;  %v2325_v1 = vmax.f32 %v2275_v57, 0.0 }
 0x384   : > { %v2324_v63 = vmax.f32 %v2270_v61, 0.0  ;;  %v3810_v21 = vpop.f32.mrb[18].mxu1  ;;  %v4904_v61 = vadd.f32 %v4591_v22, %v4862_v39  ;;  %v4922_v22 = vadd.f32 %v4619_v44, %v4862_v39 }
 0x385   : > { %v2285_v9 = vadd.f32 %v3810_v21, %v4815_v49  ;;  %v2279_v5 = vpop.f32.mrb[19].mxu1  ;;  %v4914_v21 = vadd.f32 %v4605_v36, %v4862_v39 }
 0x386   : > { %v2280_v35 = vadd.f32 %v4815_v49, %v2279_v5  ;;  %3885 = vmatprep.mubr.f32.mxu1 %v2324_v63 }
 0x387   : > { %3886 = vmatmul.mubr.f32.gmra.mrb[48].mxu1 %v2325_v1  ;;  %v2327_v19 = vmax.f32 %v2285_v9, 0.0 }
 0x388   : > { %v2326_v13 = vmax.f32 %v2280_v35, 0.0  ;;  %v3813_v15 = vpop.f32.mrb[20].mxu1 }
 0x389   : > { %v2295_v41 = vadd.f32 %v3813_v15, %v4815_v49  ;;  %v2289_v47 = vpop.f32.mrb[21].mxu1  ;;  %v4943_v15 = vadd.f32 %v4647_v0, %v4862_v39 }
 0x38a   : > { %v2290_v18 = vadd.f32 %v4815_v49, %v2289_v47  ;;  %3888 = vmatprep.mubr.f32.mxu1 %v2326_v13  ;;  %v4860_v49 = vld [vmem:[#allocation3 + $0x8] sm:$0xff] }
 0x38b   : > { %3889 = vmatmul.mubr.f32.gmra.mrb[50].mxu1 %v2327_v19  ;;  %v2329_v23 = vmax.f32 %v2295_v41, 0.0  ;;  %v4868_v42 = vadd.f32 %v4546_v50, %v4860_v49  ;;  %v4878_v14 = vadd.f32 %v4558_v59, %v4860_v49  ;;  %v4889_v53 = vadd.f32 %v4572_v3, %v4860_v49  ;;  %5574 = vst [vmem:[#allocation10_spill] sm:$0xff] %v4943_v15 }
 0x38c   : > { %v2328_v6 = vmax.f32 %v2290_v18, 0.0  ;;  %v4897_v59 = vadd.f32 %v4586_v16, %v4860_v49  ;;  %v4908_v63 = vadd.f32 %v4600_v31, %v4860_v49  ;;  %v4918_v16 = vadd.f32 %v4614_v40, %v4860_v49 }
 0x38d   : > { %v4928_v9 = vadd.f32 %v4628_v48, %v4860_v49  ;;  %v4935_v40 = vadd.f32 %v4633_v54, %v4862_v39  ;;  %v4939_v44 = vadd.f32 %v4642_v60, %v4860_v49  ;;  %v4950_v19 = vadd.f32 %v4662_v12, %v4860_v49 }
 0x38e   : > { %3891 = vmatprep.mubr.f32.mxu1 %v2328_v6  ;;  %5571 = vst [vmem:[#allocation7_spill] sm:$0xff] %v4918_v16  ;;  %v4956_v60 = vadd.f32 %v4667_v17, %v4862_v39  ;;  %v4960_v0 = vadd.f32 %v4683_v56, %v4860_v49  ;;  %v4964_v18 = vadd.f32 %v4688_v38, %v4862_v39 }
 0x38f   : > { %3892 = vmatmul.mubr.f32.gmra.mrb[52].mxu1 %v2329_v23  ;;  %5572 = vst [vmem:[#allocation8_spill] sm:$0xff] %v4928_v9  ;;  %5573 = vst [vmem:[#allocation9_spill] sm:$0xff] %v4939_v44  ;;  %v4977_v56 = vadd.f32 %v4708_v52, %v4862_v39  ;;  %v4981_v38 = vadd.f32 %v4723_v25, %v4860_v49  ;;  %v4994_v52 = vadd.f32 %v4743_v26, %v4860_v49 }
 0x390   : > { %5575 = vst [vmem:[#allocation11_spill] sm:$0xff] %v4950_v19  ;;  %5576 = vst [vmem:[#allocation12_spill] sm:$0xff] %v4956_v60  ;;  %v4998_v25 = vadd.f32 %v4748_v28, %v4862_v39  ;;  %v5008_v26 = vadd.f32 %v4768_v45, %v4862_v39 }
 0x391   : > { %5577 = vst [vmem:[#allocation13_spill] sm:$0xff] %v4960_v0  ;;  %5578 = vst [vmem:[#allocation14_spill] sm:$0xff] %v4964_v18 }
 0x392   : > { %5580 = vst [vmem:[#allocation16_spill] sm:$0xff] %v4977_v56  ;;  %5581 = vst [vmem:[#allocation17_spill] sm:$0xff] %v4981_v38 }
 0x393   : > { %5583 = vst [vmem:[#allocation19_spill] sm:$0xff] %v4994_v52  ;;  %5584 = vst [vmem:[#allocation20_spill] sm:$0xff] %v4998_v25 }
 0x394   : > { %5586 = vst [vmem:[#allocation22_spill] sm:$0xff] %v5008_v26 }
 0x426   : > { %v3848_v32 = vpop.f32.mrb[22].mxu1 }
 0x427   : > { %v4855_v33 = vadd.f32 %v3848_v32, %v4852_v27  ;;  %v2403_v8 = vpop.f32.mrb[23].mxu1 }
 0x428   : > { %v4858_v37 = vadd.f32 %v4852_v27, %v2403_v8 }
 0x429   : > { %v2563_v46 = vsel %vm605_vm1, %v4855_v33, -inf }
 0x42a   : > { %v2562_v7 = vsel %vm605_vm1, %v4858_v37, -inf  ;;  %v3851_v20 = vpop.f32.mrb[24].mxu1 }
 0x42b   : > { %v2564_v11 = vmax.f32 %v2562_v7, %v2563_v46  ;;  %v4885_v50 = vadd.f32 %v3851_v20, %v4852_v27  ;;  %v2413_v57 = vpop.f32.mrb[25].mxu1  ;;  %v4973_v7 = vadd.f32 %v4703_v24, %v4860_v49  ;;  %v4990_v24 = vadd.f32 %v4728_v4, %v4862_v39 }
 0x42c   : > { %v4900_v62 = vadd.f32 %v4852_v27, %v2413_v57  ;;  %v5004_v4 = vadd.f32 %v4763_v30, %v4860_v49  ;;  %v5020_v30 = vadd.f32 %v4777_v55, %v4860_v49 }
 0x42d   : > { %v2565_v3 = vrot.slane %v2564_v11, 4  ;;  %v2572_v10 = vsel %vm605_vm1, %v4885_v50, -inf  ;;  %5579 = vst [vmem:[#allocation15_spill] sm:$0xff] %v4973_v7  ;;  %5582 = vst [vmem:[#allocation18_spill] sm:$0xff] %v4990_v24 }
 0x42e   : > { %v2571_v31 = vsel %vm605_vm1, %v4900_v62, -inf  ;;  %v3854_v1 = vpop.f32.mrb[26].mxu1  ;;  %5585 = vst [vmem:[#allocation21_spill] sm:$0xff] %v5004_v4  ;;  %5587 = vst [vmem:[#allocation23_spill] sm:$0xff] %v5020_v30 }
 0x42f   : > { %v2566_v5 = vmax.f32 %v2564_v11, %v2565_v3  ;;  %v2573_v35 = vmax.f32 %v2571_v31, %v2572_v10  ;;  %v4931_v36 = vadd.f32 %v3854_v1, %v4852_v27  ;;  %v2423_v13 = vpop.f32.mrb[27].mxu1 }
 0x430   : > { %v4946_v48 = vadd.f32 %v4852_v27, %v2423_v13 }
 0x431   : > { %v2567_v41 = vrot.slane %v2566_v5, 2  ;;  %v2574_v47 = vrot.slane %v2573_v35, 4  ;;  %v2581_v54 = vsel %vm605_vm1, %v4931_v36, -inf }
 0x432   : > { %v2580_v12 = vsel %vm605_vm1, %v4946_v48, -inf  ;;  %v3857_v6 = vpop.f32.mrb[28].mxu1 }
 0x433   : > { %v2568_v23 = vmax.f32 %v2566_v5, %v2567_v41  ;;  %v2575_v32 = vmax.f32 %v2573_v35, %v2574_v47  ;;  %v2582_v8 = vmax.f32 %v2580_v12, %v2581_v54  ;;  %v4969_v46 = vadd.f32 %v3857_v6, %v4852_v27  ;;  %v2433_v17 = vpop.f32.mrb[29].mxu1 }
 0x434   : > { %v4984_v20 = vadd.f32 %v4852_v27, %v2433_v17 }
 0x435   : > { %v2569_v11 = vrot.slane %v2568_v23, 1  ;;  %v2576_v57 = vrot.slane %v2575_v32, 2  ;;  %v2583_v3 = vrot.slane %v2582_v8, 4  ;;  %v2590_v10 = vsel %vm605_vm1, %v4969_v46, -inf }
 0x436   : > { %v2589_v31 = vsel %vm605_vm1, %v4984_v20, -inf  ;;  %v3860_v1 = vpop.f32.mrb[30].mxu1 }
 0x437   : > { %v2570_v5 = vmax.f32 %v2568_v23, %v2569_v11  ;;  %v2577_v35 = vmax.f32 %v2575_v32, %v2576_v57  ;;  %v2584_v13 = vmax.f32 %v2582_v8, %v2583_v3  ;;  %v2591_v41 = vmax.f32 %v2589_v31, %v2590_v10  ;;  %v2443_v47 = vpop.f32.mrb[31].mxu1 }
 0x438   : > { %v5011_v28 = vadd.f32 %v3860_v1, %v4852_v27  ;;  %v5014_v54 = vadd.f32 %v4852_v27, %v2443_v47 }
 0x439   : > { %v2706_v12 = vsub.f32 %v4858_v37, %v2570_v5  ;;  %v2707_v6 = vsub.f32 %v4855_v33, %v2570_v5  ;;  %v2578_v23 = vrot.slane %v2577_v35, 1  ;;  %v2585_v32 = vrot.slane %v2584_v13, 2 }
 0x43a   : > { %v2592_v8 = vrot.slane %v2591_v41, 4  ;;  %v2599_v45 = vsel %vm605_vm1, %v5011_v28, -inf  ;;  %v2598_v17 = vsel %vm605_vm1, %v5014_v54, -inf  ;;  %v3863_v11 = vpop.f32.mrb[32].mxu1 }
 0x43b   : > { %v2738_v57 = vmul.f32 1.442695, %v2706_v12  ;;  %v2740_v3 = vmul.f32 1.442695, %v2707_v6  ;;  %v2579_v10 = vmax.f32 %v2577_v35, %v2578_v23  ;;  %v2586_v37 = vmax.f32 %v2584_v13, %v2585_v32  ;;  %v2453_v31 = vpop.f32.mrb[33].mxu1 }
 0x43c   : > { %v2593_v33 = vmax.f32 %v2591_v41, %v2592_v8  ;;  %v2600_v1 = vmax.f32 %v2598_v17, %v2599_v45  ;;  %v5027_v5 = vadd.f32 %v3863_v11, %v4852_v27  ;;  %v5030_v55 = vadd.f32 %v4852_v27, %v2453_v31 }
 0x43d   : > { %4026 = vpow2.f32 %v2738_v57  ;;  %v2708_v49 = vsub.f32 %v4900_v62, %v2579_v10  ;;  %v2709_v47 = vsub.f32 %v4885_v50, %v2579_v10  ;;  %v2587_v29 = vrot.slane %v2586_v37, 1 }
 0x43e   : > { %4028 = vpow2.f32 %v2740_v3  ;;  %v2594_v12 = vrot.slane %v2593_v33, 2  ;;  %v2601_v6 = vrot.slane %v2600_v1, 4  ;;  %v2608_v35 = vsel %vm605_vm1, %v5027_v5, -inf  ;;  %v3866_v13 = vpop.f32.mrb[34].mxu1 }
 0x43f   : > { %v2742_v41 = vmul.f32 1.442695, %v2708_v49  ;;  %v2744_v23 = vmul.f32 1.442695, %v2709_v47  ;;  %v2588_v32 = vmax.f32 %v2586_v37, %v2587_v29  ;;  %v2607_v8 = vsel %vm605_vm1, %v5030_v55, -inf  ;;  %v2463_v45 = vpop.f32.mrb[35].mxu1 }
 0x440   : > { %v2595_v17 = vmax.f32 %v2593_v33, %v2594_v12  ;;  %v2602_v11 = vmax.f32 %v2600_v1, %v2601_v6  ;;  %v2609_v62 = vmax.f32 %v2607_v8, %v2608_v35  ;;  %v5039_v50 = vadd.f32 %v3866_v13, %v4852_v27 }
 0x441   : > { %4030 = vpow2.f32 %v2742_v41  ;;  %v2710_v57 = vsub.f32 %v4946_v48, %v2588_v32  ;;  %v2711_v3 = vsub.f32 %v4931_v36, %v2588_v32  ;;  %v5044_v10 = vadd.f32 %v4852_v27, %v2463_v45 }
 0x442   : > { %4032 = vpow2.f32 %v2744_v23  ;;  %v2596_v29 = vrot.slane %v2595_v17, 1  ;;  %v2603_v37 = vrot.slane %v2602_v11, 2  ;;  %v2610_v31 = vrot.slane %v2609_v62, 4  ;;  %v3869_v49 = vpop.f32.mrb[36].mxu1 }
 0x443   : > { %v2746_v47 = vmul.f32 1.442695, %v2710_v57  ;;  %v2748_v33 = vmul.f32 1.442695, %v2711_v3  ;;  %v2617_v1 = vsel %vm605_vm1, %v5039_v50, -inf  ;;  %v2616_v12 = vsel %vm605_vm1, %v5044_v10, -inf }
 0x444   : > { %v2597_v6 = vmax.f32 %v2595_v17, %v2596_v29  ;;  %v2604_v48 = vmax.f32 %v2602_v11, %v2603_v37  ;;  %v2611_v35 = vmax.f32 %v2609_v62, %v2610_v31  ;;  %v2618_v36 = vmax.f32 %v2616_v12, %v2617_v1  ;;  %v2473_v13 = vpop.f32.mrb[37].mxu1 }
 0x445   : > { %v5052_v41 = vadd.f32 %v4782_v34, %v4862_v39  ;;  %4034 = vpow2.f32 %v2746_v47  ;;  %v5055_v23 = vadd.f32 %v3869_v49, %v4852_v27  ;;  %v5058_v32 = vadd.f32 %v4852_v27, %v2473_v13 }
 0x446   : > { %4036 = vpow2.f32 %v2748_v33  ;;  %v2712_v8 = vsub.f32 %v4984_v20, %v2597_v6  ;;  %v2713_v45 = vsub.f32 %v4969_v46, %v2597_v6  ;;  %v2605_v17 = vrot.slane %v2604_v48, 1  ;;  %v3872_v11 = vpop.f32.mrb[38].mxu1 }
 0x447   : > { %5588 = vst [vmem:[#allocation24_spill] sm:$0xff] %v5052_v41  ;;  %v5062_v62 = vpop.eup %4026  ;;  %v2612_v57 = vrot.slane %v2611_v35, 2  ;;  %v2619_v3 = vrot.slane %v2618_v36, 4  ;;  %v2626_v34 = vsel %vm605_vm1, %v5055_v23, -inf  ;;  %v2625_v39 = vsel %vm605_vm1, %v5058_v32, -inf  ;;  %v5068_v29 = vpop.f32.mrb[39].mxu1 }
 0x448   : > { %v5070_v37 = vpop.eup %4028  ;;  %v2802_v20 = vsel %vm605_vm1, %v5062_v62, 0.0  ;;  %v2750_v46 = vmul.f32 1.442695, %v2712_v8  ;;  %v2752_v31 = vmul.f32 1.442695, %v2713_v45  ;;  %v2606_v49 = vmax.f32 %v2604_v48, %v2605_v17 }
 0x449   : > { %v2803_v47 = vsel %vm605_vm1, %v5070_v37, 0.0  ;;  %v2613_v33 = vmax.f32 %v2611_v35, %v2612_v57  ;;  %v2620_v1 = vmax.f32 %v2618_v36, %v2619_v3  ;;  %v2627_v12 = vmax.f32 %v2625_v39, %v2626_v34 }
 0x44a   : > { %v2804_v6 = vadd.f32 %v2803_v47, %v2802_v20  ;;  %4038 = vpow2.f32 %v2750_v46  ;;  %v2714_v13 = vsub.f32 %v5014_v54, %v2606_v49  ;;  %v2715_v2 = vsub.f32 %v5011_v28, %v2606_v49  ;;  %v5078_v30 = vpop.f32.mrb[40].mxu1 }
 0x44b   : > { %v5080_v41 = vpop.eup %4030  ;;  %4040 = vpow2.f32 %v2752_v31  ;;  %v2614_v8 = vrot.slane %v2613_v33, 1  ;;  %v2621_v45 = vrot.slane %v2620_v1, 2  ;;  %v2628_v48 = vrot.slane %v2627_v12, 4  ;;  %v5082_v17 = vpop.f32.mrb[41].mxu1 }
 0x44c   : > { %v5084_v4 = vpop.eup %4032  ;;  %v2805_v35 = vrot.slane %v2804_v6, 4  ;;  %v2811_v36 = vsel %vm605_vm1, %v5080_v41, 0.0  ;;  %v2754_v57 = vmul.f32 1.442695, %v2714_v13  ;;  %v2756_v54 = vmul.f32 1.442695, %v2715_v2 }
 0x44d   : > { %v2812_v28 = vsel %vm605_vm1, %v5084_v4, 0.0  ;;  %v2615_v3 = vmax.f32 %v2613_v33, %v2614_v8  ;;  %v2622_v34 = vmax.f32 %v2620_v1, %v2621_v45  ;;  %v2629_v39 = vmax.f32 %v2627_v12, %v2628_v48 }
 0x44e   : > { %v2806_v20 = vadd.f32 %v2805_v35, %v2804_v6  ;;  %v2813_v46 = vadd.f32 %v2812_v28, %v2811_v36  ;;  %4042 = vpow2.f32 %v2754_v57  ;;  %v5091_v31 = vadd.f32 %v3872_v11, %v4852_v27  ;;  %v5093_v49 = vpop.f32.mrb[42].mxu1 }
 0x44f   : > { %v5095_v47 = vpop.eup %4034  ;;  %4044 = vpow2.f32 %v2756_v54  ;;  %v2716_v13 = vsub.f32 %v5030_v55, %v2615_v3  ;;  %v2717_v2 = vsub.f32 %v5027_v5, %v2615_v3  ;;  %v2623_v26 = vrot.slane %v2622_v34, 1  ;;  %v5099_v52 = vpop.f32.mrb[43].mxu1 }
 0x450   : > { %v5101_v33 = vpop.eup %4036  ;;  %v2807_v1 = vrot.slane %v2806_v20, 2  ;;  %v2814_v12 = vrot.slane %v2813_v46, 4  ;;  %v2820_v11 = vsel %vm605_vm1, %v5095_v47, 0.0  ;;  %v2630_v6 = vrot.slane %v2629_v39, 2 }
 0x451   : > { %v2821_v8 = vsel %vm605_vm1, %v5101_v33, 0.0  ;;  %v2758_v45 = vmul.f32 1.442695, %v2716_v13  ;;  %v2760_v48 = vmul.f32 1.442695, %v2717_v2  ;;  %v2624_v35 = vmax.f32 %v2622_v34, %v2623_v26 }
 0x452   : > { %v2808_v55 = vadd.f32 %v2807_v1, %v2806_v20  ;;  %v2815_v36 = vadd.f32 %v2814_v12, %v2813_v46  ;;  %v2822_v5 = vadd.f32 %v2821_v8, %v2820_v11  ;;  %v2631_v57 = vmax.f32 %v2629_v39, %v2630_v6  ;;  %v5107_v54 = vpop.f32.mrb[44].mxu1 }
 0x453   : > { %4046 = vpow2.f32 %v2758_v45  ;;  %v2718_v28 = vsub.f32 %v5044_v10, %v2624_v35  ;;  %v2719_v3 = vsub.f32 %v5039_v50, %v2624_v35  ;;  %v2635_v25 = vsel %vm605_vm1, %v5091_v31, -inf  ;;  %v5113_v38 = vpop.f32.mrb[45].mxu1 }
 0x454   : > { %v5115_v24 = vpop.eup %4038  ;;  %v2809_v13 = vrot.slane %v2808_v55, 1  ;;  %v2816_v26 = vrot.slane %v2815_v36, 2  ;;  %v2823_v34 = vrot.slane %v2822_v5, 4  ;;  %4048 = vpow2.f32 %v2760_v48 }
 0x455   : > { %v5117_v20 = vpop.eup %4040  ;;  %v2829_v39 = vsel %vm605_vm1, %v5115_v24, 0.0  ;;  %v2762_v46 = vmul.f32 1.442695, %v2718_v28  ;;  %v2764_v10 = vmul.f32 1.442695, %v2719_v3  ;;  %v2632_v2 = vrot.slane %v2631_v57, 1 }
 0x456   : > { %v2810_v50 = vadd.f32 %v2809_v13, %v2808_v55  ;;  %v2817_v1 = vadd.f32 %v2816_v26, %v2815_v36  ;;  %v2824_v12 = vadd.f32 %v2823_v34, %v2822_v5  ;;  %v2830_v11 = vsel %vm605_vm1, %v5117_v20, 0.0  ;;  %v5123_v6 = vpop.f32.mrb[46].mxu1 }
 0x457   : > { %v2831_v8 = vadd.f32 %v2830_v11, %v2829_v39  ;;  %4050 = vpow2.f32 %v2762_v46  ;;  %v2633_v45 = vmax.f32 %v2631_v57, %v2632_v2  ;;  %v5127_v48 = vadd.f32 %v4852_v27, %v5068_v29  ;;  %v5129_v35 = vpop.f32.mrb[47].mxu1 }
 0x458   : > { %v5131_v28 = vpop.eup %4042  ;;  %4052 = vrcp.f32 %v2810_v50  ;;  %v2818_v55 = vrot.slane %v2817_v1, 1  ;;  %v2825_v36 = vrot.slane %v2824_v12, 2  ;;  %v5135_v5 = vadd.f32 %v5078_v30, %v4852_v27 }
 0x459   : > { %v5137_v3 = vpop.eup %4044  ;;  %v2832_v13 = vrot.slane %v2831_v8, 4  ;;  %v2838_v57 = vsel %vm605_vm1, %v5131_v28, 0.0  ;;  %4054 = vpow2.f32 %v2764_v10  ;;  %v2720_v29 = vsub.f32 %v5058_v32, %v2633_v45 }
 0x45a   : > { %v2819_v26 = vadd.f32 %v2818_v55, %v2817_v1  ;;  %v2826_v34 = vadd.f32 %v2825_v36, %v2824_v12  ;;  %v2839_v39 = vsel %vm605_vm1, %v5137_v3, 0.0  ;;  %v2721_v46 = vsub.f32 %v5055_v23, %v2633_v45  ;;  %v5145_v2 = vpop.f32.mrb[48].mxu1 }
 0x45b   : > { %v2833_v30 = vadd.f32 %v2832_v13, %v2831_v8  ;;  %v2840_v50 = vadd.f32 %v2839_v39, %v2838_v57  ;;  %v2766_v11 = vmul.f32 1.442695, %v2720_v29  ;;  %v2634_v7 = vsel %vm605_vm1, %v5127_v48, -inf  ;;  %v5149_v56 = vpop.f32.mrb[49].mxu1 }
 0x45c   : > { %4056 = vrcp.f32 %v2819_v26  ;;  %v2827_v10 = vrot.slane %v2826_v34, 1  ;;  %v2768_v32 = vmul.f32 1.442695, %v2721_v46  ;;  %v2636_v1 = vmax.f32 %v2634_v7, %v2635_v25 }
 0x45d   : > { %v5151_v12 = vpop.eup %4046  ;;  %v2834_v55 = vrot.slane %v2833_v30, 2  ;;  %v2841_v36 = vrot.slane %v2840_v50, 4  ;;  %4058 = vpow2.f32 %v2766_v11  ;;  %v2644_v23 = vsel %vm605_vm1, %v5135_v5, -inf }
 0x45e   : > { %v5155_v8 = vpop.eup %4048  ;;  %v2828_v45 = vadd.f32 %v2827_v10, %v2826_v34  ;;  %v2847_v13 = vsel %vm605_vm1, %v5151_v12, 0.0  ;;  %4060 = vpow2.f32 %v2768_v32  ;;  %v2637_v57 = vrot.slane %v2636_v1, 4  ;;  %v5159_v29 = vpop.f32.mrb[50].mxu1 }
 0x45f   : > { %5589 = vst [vmem:[#allocation25_spill] sm:$0xff] %v5159_v29  ;;  %v2835_v26 = vadd.f32 %v2834_v55, %v2833_v30  ;;  %v2842_v7 = vadd.f32 %v2841_v36, %v2840_v50  ;;  %v2848_v25 = vsel %vm605_vm1, %v5155_v8, 0.0  ;;  %v5165_v39 = vadd.f32 %v4852_v27, %v5082_v17  ;;  %v5167_v46 = vpop.f32.mrb[51].mxu1 }
 0x460   : > { %5590 = vst [vmem:[#allocation26_spill] sm:$0xff] %v5167_v46  ;;  %4062 = vrcp.f32 %v2828_v45  ;;  %v2849_v34 = vadd.f32 %v2848_v25, %v2847_v13  ;;  %v2638_v11 = vmax.f32 %v2636_v1, %v2637_v57  ;;  %v5171_v10 = vadd.f32 %v5093_v49, %v4852_v27 }
 0x461   : > { %v5173_v32 = vpop.eup %4050  ;;  %v2836_v30 = vrot.slane %v2835_v26, 1  ;;  %v2843_v50 = vrot.slane %v2842_v7, 2  ;;  %v2643_v55 = vsel %vm605_vm1, %v5165_v39, -inf  ;;  %v5179_v17 = vadd.f32 %v4852_v27, %v5099_v52 }
 0x462   : > { %v4053_v36 = vpop.eup %4052  ;;  %v2850_v0 = vrot.slane %v2849_v34, 4  ;;  %v2856_v1 = vsel %vm605_vm1, %v5173_v32, 0.0  ;;  %v2639_v45 = vrot.slane %v2638_v11, 2  ;;  %v2645_v13 = vmax.f32 %v2643_v55, %v2644_v23  ;;  %v5183_v49 = vpop.f32.mrb[52].mxu1 }
 0x463   : > { %5591 = vst [vmem:[#allocation27_spill] sm:$0xff] %v5183_v49  ;;  %v5185_v57 = vpop.eup %4054  ;;  %v2962_v25 = vmul.f32 %v4053_v36, %v5062_v62  ;;  %v2963_v18 = vmul.f32 %v4053_v36, %v5070_v37  ;;  %v2837_v19 = vadd.f32 %v2836_v30, %v2835_v26  ;;  %v2844_v60 = vadd.f32 %v2843_v50, %v2842_v7  ;;  %v5189_v44 = vpop.f32.mrb[53].mxu1 }
 0x464   : > { %v2851_v52 = vadd.f32 %v2850_v0, %v2849_v34  ;;  %v2857_v15 = vsel %vm605_vm1, %v5185_v57, 0.0  ;;  %v2640_v9 = vmax.f32 %v2638_v11, %v2639_v45  ;;  %v2646_v16 = vrot.slane %v2645_v13, 4 }
 0x465   : > { %v3026_v23 = vmul.f32 %v4872_v43, %v2962_v25  ;;  %v3027_v55 = vmul.f32 %v4868_v42, %v2963_v18  ;;  %4064 = vrcp.f32 %v2837_v19  ;;  %v2845_v49 = vrot.slane %v2844_v60, 1 }
 0x466   : > { %v4057_v46 = vpop.eup %4056  ;;  %v2852_v62 = vrot.slane %v2851_v52, 2  ;;  %v2858_v29 = vadd.f32 %v2857_v15, %v2856_v1  ;;  %v2641_v37 = vrot.slane %v2640_v9, 1  ;;  %v5195_v26 = vmax.f32 %v2645_v13, %v2646_v16 }
 0x467   : > { %v5197_v7 = vpop.eup %4058  ;;  %v3058_v0 = vsel %vm605_vm1, %v3026_v23, 0.0  ;;  %v3059_v34 = vsel %vm605_vm1, %v3027_v55, 0.0  ;;  %v2964_v11 = vmul.f32 %v4057_v46, %v5080_v41  ;;  %v2965_v43 = vmul.f32 %v4057_v46, %v5084_v4 }
 0x468   : > { %v5203_v30 = vpop.eup %4060  ;;  %v3060_v42 = vadd.f32 %v3059_v34, %v3058_v0  ;;  %v2846_v19 = vadd.f32 %v2845_v49, %v2844_v60  ;;  %v2853_v18 = vadd.f32 %v2852_v62, %v2851_v52  ;;  %v2859_v50 = vrot.slane %v2858_v29, 4 }
 0x469   : > { %v3028_v15 = vmul.f32 %v4882_v51, %v2964_v11  ;;  %v3029_v16 = vmul.f32 %v4878_v14, %v2965_v43  ;;  %v2865_v36 = vsel %vm605_vm1, %v5197_v7, 0.0  ;;  %v2866_v1 = vsel %vm605_vm1, %v5203_v30, 0.0 }
 0x46a   : > { %v4063_v45 = vpop.eup %4062  ;;  %v3061_v41 = vrot.slane %v3060_v42, 4  ;;  %4066 = vrcp.f32 %v2846_v19  ;;  %v2854_v4 = vrot.slane %v2853_v18, 1  ;;  %v2860_v46 = vadd.f32 %v2859_v50, %v2858_v29 }
 0x46b   : > { %v3067_v13 = vsel %vm605_vm1, %v3028_v15, 0.0  ;;  %v3068_v60 = vsel %vm605_vm1, %v3029_v16, 0.0  ;;  %v2966_v49 = vmul.f32 %v4063_v45, %v5095_v47  ;;  %v2967_v51 = vmul.f32 %v4063_v45, %v5101_v33 }
 0x46c   : > { %v5215_v14 = vadd.f32 %v3061_v41, %v3060_v42  ;;  %v3069_v25 = vadd.f32 %v3068_v60, %v3067_v13  ;;  %v2855_v52 = vadd.f32 %v2854_v4, %v2853_v18  ;;  %v2861_v23 = vrot.slane %v2860_v46, 2 }
 0x46d   : > { %v3030_v55 = vmul.f32 %v4893_v58, %v2966_v49  ;;  %v3031_v62 = vmul.f32 %v4889_v53, %v2967_v51  ;;  %v2867_v0 = vadd.f32 %v2866_v1, %v2865_v36  ;;  %v2642_v34 = vmax.f32 %v2640_v9, %v2641_v37 }
 0x46e   : > { %v3063_v29 = vrot.slane %v5215_v14, 2  ;;  %v3070_v11 = vrot.slane %v3069_v25, 4  ;;  %4068 = vrcp.f32 %v2855_v52  ;;  %v2862_v43 = vadd.f32 %v2861_v23, %v2860_v46 }
 0x46f   : > { %v4065_v19 = vpop.eup %4064  ;;  %v3076_v47 = vsel %vm605_vm1, %v3030_v55, 0.0  ;;  %v3077_v33 = vsel %vm605_vm1, %v3031_v62, 0.0  ;;  %v2868_v42 = vrot.slane %v2867_v0, 4  ;;  %v2722_v18 = vsub.f32 %v5127_v48, %v2642_v34 }
 0x470   : > { %v5223_v50 = vadd.f32 %v3070_v11, %v3069_v25  ;;  %v5225_v58 = vadd.f32 %v3077_v33, %v3076_v47  ;;  %v2968_v53 = vmul.f32 %v4065_v19, %v5115_v24  ;;  %v2969_v9 = vmul.f32 %v4065_v19, %v5117_v20 }
 0x471   : > { %v2863_v37 = vrot.slane %v2862_v43, 1  ;;  %v2869_v15 = vadd.f32 %v2868_v42, %v2867_v0  ;;  %v2723_v16 = vsub.f32 %v5091_v31, %v2642_v34  ;;  %v2770_v36 = vmul.f32 1.442695, %v2722_v18 }
 0x472   : > { %v3072_v1 = vrot.slane %v5223_v50, 2  ;;  %v3079_v45 = vrot.slane %v5225_v58, 4  ;;  %v3032_v41 = vmul.f32 %v4904_v61, %v2968_v53  ;;  %v3033_v48 = vmul.f32 %v4897_v59, %v2969_v9 }
 0x473   : > { %v2864_v4 = vadd.f32 %v2863_v37, %v2862_v43  ;;  %v2870_v46 = vrot.slane %v2869_v15, 2  ;;  %4070 = vpow2.f32 %v2770_v36  ;;  %v2772_v13 = vmul.f32 1.442695, %v2723_v16 }
 0x474   : > { %v4067_v24 = vpop.eup %4066  ;;  %v3085_v20 = vsel %vm605_vm1, %v3032_v41, 0.0  ;;  %v3086_v60 = vsel %vm605_vm1, %v3033_v48, 0.0  ;;  %v2648_v31 = vrot.slane %v5195_v26, 2  ;;  %v2653_v49 = vsel %vm605_vm1, %v5171_v10, -inf }
 0x475   : > { %v5239_v51 = vadd.f32 %v3086_v60, %v3085_v20  ;;  %v2970_v61 = vmul.f32 %v4067_v24, %v5131_v28  ;;  %v2971_v59 = vmul.f32 %v4067_v24, %v5137_v3  ;;  %4072 = vrcp.f32 %v2864_v4 }
 0x476   : > { %v2871_v25 = vadd.f32 %v2870_v46, %v2869_v15  ;;  %4074 = vpow2.f32 %v2772_v13  ;;  %v2649_v52 = vmax.f32 %v5195_v26, %v2648_v31  ;;  %v2652_v23 = vsel %vm605_vm1, %v5179_v17, -inf }
 0x477   : > { %v3034_v55 = vmul.f32 %v4914_v21, %v2970_v61  ;;  %v5248_v62 = vmul.f32 %v4908_v63, %v2971_v59  ;;  %v2654_v0 = vmax.f32 %v2652_v23, %v2653_v49  ;;  %v5252_v34 = vadd.f32 %v5107_v54, %v4852_v27 }
 0x478   : > { %v4069_v28 = vpop.eup %4068  ;;  %v2872_v3 = vrot.slane %v2871_v25, 1  ;;  %v2650_v11 = vrot.slane %v2649_v52, 1  ;;  %v5256_v43 = vadd.f32 %v4852_v27, %v5113_v38  ;;  %v5260_v26 = vadd.f32 %v5123_v6, %v4852_v27 }
 0x479   : > { %v5263_v21 = vsel %vm605_vm1, %v3034_v55, 0.0  ;;  %v2972_v63 = vmul.f32 %v4069_v28, %v5151_v12  ;;  %v5267_v19 = vmul.f32 %v4069_v28, %v5155_v8  ;;  %v2655_v54 = vrot.slane %v2654_v0, 4 }
 0x47a   : > { %v2873_v47 = vadd.f32 %v2872_v3, %v2871_v25  ;;  %v2651_v33 = vmax.f32 %v2649_v52, %v2650_v11  ;;  %v2662_v42 = vsel %vm605_vm1, %v5252_v34, -inf  ;;  %v2661_v38 = vsel %vm605_vm1, %v5256_v43, -inf  ;;  %v5593_v3 = vld [vmem:[#allocation26_spill] sm:$0xff] }
 0x47b   : > { %v5274_v6 = vmul.f32 %v4922_v22, %v2972_v63  ;;  %v2656_v18 = vmax.f32 %v2654_v0, %v2655_v54  ;;  %v2663_v53 = vmax.f32 %v2661_v38, %v2662_v42  ;;  %v2671_v12 = vsel %vm605_vm1, %v5260_v26, -inf }
 0x47c   : > { %4076 = vrcp.f32 %v2873_v47  ;;  %v2724_v8 = vsub.f32 %v5165_v39, %v2651_v33  ;;  %v2725_v9 = vsub.f32 %v5135_v5, %v2651_v33  ;;  %v5282_v37 = vadd.f32 %v4852_v27, %v5129_v35  ;;  %v5594_v33 = vld [vmem:[#allocation27_spill] sm:$0xff] }
 0x47d   : > { %v5284_v15 = vpop.eup %4070  ;;  %v2657_v16 = vrot.slane %v2656_v18, 2  ;;  %v2664_v36 = vrot.slane %v2663_v53, 4  ;;  %v5288_v22 = vadd.f32 %v5145_v2, %v4852_v27  ;;  %v5292_v41 = vadd.f32 %v4852_v27, %v5149_v56 }
 0x47e   : > { %v2874_v39 = vsel %vm605_vm1, %v5284_v15, 0.0  ;;  %v2774_v5 = vmul.f32 1.442695, %v2724_v8  ;;  %v2776_v48 = vmul.f32 1.442695, %v2725_v9  ;;  %v2670_v35 = vsel %vm605_vm1, %v5282_v37, -inf }
 0x47f   : > { %v4073_v4 = vpop.eup %4072  ;;  %v2658_v46 = vmax.f32 %v2656_v18, %v2657_v16  ;;  %v2665_v13 = vmax.f32 %v2663_v53, %v2664_v36  ;;  %v2672_v24 = vmax.f32 %v2670_v35, %v2671_v12  ;;  %v2680_v2 = vsel %vm605_vm1, %v5288_v22, -inf }
 0x480   : > { %v5300_v20 = vpop.eup %4074  ;;  %v2974_v56 = vmul.f32 %v4073_v4, %v5173_v32  ;;  %v5304_v60 = vmul.f32 %v4073_v4, %v5185_v57  ;;  %4078 = vpow2.f32 %v2774_v5  ;;  %v2679_v31 = vsel %vm605_vm1, %v5292_v41, -inf  ;;  %v5592_v57 = vld [vmem:[#allocation25_spill] sm:$0xff] }
 0x481   : > { %v2875_v49 = vsel %vm605_vm1, %v5300_v20, 0.0  ;;  %4080 = vpow2.f32 %v2776_v48  ;;  %v2659_v61 = vrot.slane %v2658_v46, 1  ;;  %v2666_v59 = vrot.slane %v2665_v13, 2 }
 0x482   : > { %v5311_v25 = vmul.f32 %v4935_v40, %v2974_v56  ;;  %v2876_v52 = vadd.f32 %v2875_v49, %v2874_v39  ;;  %v2673_v23 = vrot.slane %v2672_v24, 4  ;;  %v2681_v55 = vmax.f32 %v2679_v31, %v2680_v2 }
 0x483   : > { %v2660_v32 = vmax.f32 %v2658_v46, %v2659_v61  ;;  %v2667_v0 = vmax.f32 %v2665_v13, %v2666_v59  ;;  %v5315_v28 = vadd.f32 %v5592_v57, %v4852_v27  ;;  %v5319_v11 = vadd.f32 %v4852_v27, %v5593_v3 }
 0x484   : > { %v2877_v63 = vrot.slane %v2876_v52, 4  ;;  %v2674_v54 = vmax.f32 %v2672_v24, %v2673_v23  ;;  %v2682_v47 = vrot.slane %v2681_v55, 4  ;;  %v5323_v40 = vadd.f32 %v5594_v33, %v4852_v27 }
 0x485   : > { %v2726_v42 = vsub.f32 %v5179_v17, %v2660_v32  ;;  %v2727_v38 = vsub.f32 %v5171_v10, %v2660_v32  ;;  %v2668_v18 = vrot.slane %v2667_v0, 1  ;;  %v2689_v53 = vsel %vm605_vm1, %v5315_v28, -inf }
 0x486   : > { %v4077_v12 = vpop.eup %4076  ;;  %v2878_v8 = vadd.f32 %v2877_v63, %v2876_v52  ;;  %v2675_v9 = vrot.slane %v2674_v54, 2  ;;  %v2683_v16 = vmax.f32 %v2681_v55, %v2682_v47  ;;  %v2688_v36 = vsel %vm605_vm1, %v5319_v11, -inf }
 0x487   : > { %v5332_v39 = vmul.f32 %v4077_v12, %v5197_v7  ;;  %v2778_v5 = vmul.f32 1.442695, %v2726_v42  ;;  %v2780_v48 = vmul.f32 1.442695, %v2727_v38  ;;  %v2669_v35 = vmax.f32 %v2667_v0, %v2668_v18 }
 0x488   : > { %v2879_v17 = vrot.slane %v2878_v8, 2  ;;  %v2676_v4 = vmax.f32 %v2674_v54, %v2675_v9  ;;  %v2684_v10 = vrot.slane %v2683_v16, 2  ;;  %v2690_v46 = vmax.f32 %v2688_v36, %v2689_v53 }
 0x489   : > { %4082 = vpow2.f32 %v2778_v5  ;;  %v2728_v13 = vsub.f32 %v5256_v43, %v2669_v35  ;;  %v2729_v24 = vsub.f32 %v5252_v34, %v2669_v35  ;;  %v2698_v2 = vsel %vm605_vm1, %v5323_v40, -inf }
 0x48a   : > { %v5338_v56 = vpop.eup %4078  ;;  %v2880_v31 = vadd.f32 %v2879_v17, %v2878_v8  ;;  %4084 = vpow2.f32 %v2780_v48  ;;  %v2677_v7 = vrot.slane %v2676_v4, 1  ;;  %v2685_v49 = vmax.f32 %v2683_v16, %v2684_v10  ;;  %v5595_v48 = vld [vmem:[#allocation7_spill] sm:$0xff] }
 0x48b   : > { %v5340_v61 = vpop.eup %4080  ;;  %v2883_v59 = vsel %vm605_vm1, %v5338_v56, 0.0  ;;  %v2782_v52 = vmul.f32 1.442695, %v2728_v13  ;;  %v2784_v23 = vmul.f32 1.442695, %v2729_v24  ;;  %v2691_v55 = vrot.slane %v2690_v46, 4 }
 0x48c   : > { %v2881_v43 = vrot.slane %v2880_v31, 1  ;;  %v2884_v34 = vsel %vm605_vm1, %v5340_v61, 0.0  ;;  %v2678_v32 = vmax.f32 %v2676_v4, %v2677_v7  ;;  %v2686_v0 = vrot.slane %v2685_v49, 1 }
 0x48d   : > { %v2885_v57 = vadd.f32 %v2884_v34, %v2883_v59  ;;  %4086 = vpow2.f32 %v2782_v52  ;;  %v2692_v3 = vmax.f32 %v2690_v46, %v2691_v55  ;;  %v5348_v63 = vadd.f32 %v4852_v27, %v5189_v44 }
 0x48e   : > { %v2882_v54 = vadd.f32 %v2881_v43, %v2880_v31  ;;  %4088 = vpow2.f32 %v2784_v23  ;;  %v2730_v47 = vsub.f32 %v5282_v37, %v2678_v32  ;;  %v2731_v33 = vsub.f32 %v5260_v26, %v2678_v32  ;;  %v5597_v31 = vld [vmem:[#allocation10_spill] sm:$0xff]  ;;  %v5598_v43 = vld [vmem:[#allocation9_spill] sm:$0xff] }
 0x48f   : > { %v2886_v42 = vrot.slane %v2885_v57, 4  ;;  %v2687_v38 = vmax.f32 %v2685_v49, %v2686_v0  ;;  %v2693_v18 = vrot.slane %v2692_v3, 2  ;;  %v2697_v53 = vsel %vm605_vm1, %v5348_v63, -inf }
 0x490   : > { %4090 = vrcp.f32 %v2882_v54  ;;  %v2786_v8 = vmul.f32 1.442695, %v2730_v47  ;;  %v2788_v9 = vmul.f32 1.442695, %v2731_v33  ;;  %v2699_v16 = vmax.f32 %v2697_v53, %v2698_v2  ;;  %v5596_v2 = vld [vmem:[#allocation8_spill] sm:$0xff] }
 0x491   : > { %v2887_v36 = vadd.f32 %v2886_v42, %v2885_v57  ;;  %v2732_v27 = vsub.f32 %v5292_v41, %v2687_v38  ;;  %v2733_v44 = vsub.f32 %v5288_v22, %v2687_v38  ;;  %v2694_v5 = vmax.f32 %v2692_v3, %v2693_v18 }
 0x492   : > { %4092 = vpow2.f32 %v2786_v8  ;;  %v2700_v37 = vrot.slane %v2699_v16, 4  ;;  %v2977_v26 = vmul.f32 %v4077_v12, %v5203_v30  ;;  %v5359_v35 = vmul.f32 %v5595_v48, %v5267_v19 }
 0x493   : > { %v5361_v17 = vpop.eup %4082  ;;  %v2888_v4 = vrot.slane %v2887_v36, 2  ;;  %4094 = vpow2.f32 %v2788_v9  ;;  %v2790_v10 = vmul.f32 1.442695, %v2732_v27  ;;  %v2792_v46 = vmul.f32 1.442695, %v2733_v44  ;;  %v5599_v44 = vld [vmem:[#allocation12_spill] sm:$0xff] }
 0x494   : > { %v5363_v13 = vpop.eup %4084  ;;  %v2892_v22 = vsel %vm605_vm1, %v5361_v17, 0.0  ;;  %v2695_v41 = vrot.slane %v2694_v5, 1  ;;  %v2701_v24 = vmax.f32 %v2699_v16, %v2700_v37  ;;  %v5369_v30 = vmul.f32 %v5596_v2, %v5304_v60  ;;  %v5600_v37 = vld [vmem:[#allocation11_spill] sm:$0xff] }
 0x495   : > { %v2889_v12 = vadd.f32 %v2888_v4, %v2887_v36  ;;  %v2893_v19 = vsel %vm605_vm1, %v5363_v13, 0.0  ;;  %4096 = vpow2.f32 %v2790_v10  ;;  %v5375_v7 = vmul.f32 %v5597_v31, %v5332_v39 }
 0x496   : > { %v2894_v49 = vadd.f32 %v2893_v19, %v2892_v22  ;;  %4098 = vpow2.f32 %v2792_v46  ;;  %v2696_v59 = vmax.f32 %v2694_v5, %v2695_v41  ;;  %v2702_v52 = vrot.slane %v2701_v24, 2 }
 0x497   : > { %v5377_v23 = vpop.eup %4086  ;;  %v2890_v55 = vrot.slane %v2889_v12, 1  ;;  %v5380_v34 = vmul.f32 %v5598_v43, %v2977_v26  ;;  %v3064_v60 = vadd.f32 %v3063_v29, %v5215_v14  ;;  %v3073_v32 = vadd.f32 %v3072_v1, %v5223_v50 }
 0x498   : > { %v5388_v39 = vpop.eup %4088  ;;  %v2895_v0 = vrot.slane %v2894_v49, 4  ;;  %v2901_v57 = vsel %vm605_vm1, %v5377_v23, 0.0  ;;  %v2734_v3 = vsub.f32 %v5319_v11, %v2696_v59  ;;  %v2735_v54 = vsub.f32 %v5315_v28, %v2696_v59 }
 0x499   : > { %v2891_v47 = vadd.f32 %v2890_v55, %v2889_v12  ;;  %v2902_v33 = vsel %vm605_vm1, %v5388_v39, 0.0  ;;  %v2703_v42 = vmax.f32 %v2701_v24, %v2702_v52  ;;  %v3065_v14 = vrot.slane %v3064_v60, 1 }
 0x49a   : > { %v4091_v29 = vpop.eup %4090  ;;  %v2896_v38 = vadd.f32 %v2895_v0, %v2894_v49  ;;  %v2903_v18 = vadd.f32 %v2902_v33, %v2901_v57  ;;  %v2794_v50 = vmul.f32 1.442695, %v2734_v3  ;;  %v2796_v1 = vmul.f32 1.442695, %v2735_v54 }
 0x49b   : > { %v2978_v53 = vmul.f32 %v4091_v29, %v5284_v15  ;;  %v2979_v8 = vmul.f32 %v4091_v29, %v5300_v20  ;;  %4100 = vrcp.f32 %v2891_v47  ;;  %v2704_v9 = vrot.slane %v2703_v42, 1 }
 0x49c   : > { %v5398_v11 = vpop.eup %4092  ;;  %v2897_v28 = vrot.slane %v2896_v38, 2  ;;  %v2904_v16 = vrot.slane %v2903_v18, 4  ;;  %4102 = vpow2.f32 %v2794_v50  ;;  %v5400_v36 = vadd.f32 %v3065_v14, %v3064_v60 }
 0x49d   : > { %v5402_v27 = vpop.eup %4094  ;;  %v3042_v5 = vmul.f32 %v5599_v44, %v2978_v53  ;;  %v3043_v26 = vmul.f32 %v5600_v37, %v2979_v8  ;;  %v2910_v15 = vsel %vm605_vm1, %v5398_v11, 0.0  ;;  %4104 = vpow2.f32 %v2796_v1 }
 0x49e   : > { %v2898_v20 = vadd.f32 %v2897_v28, %v2896_v38  ;;  %v2905_v48 = vadd.f32 %v2904_v16, %v2903_v18  ;;  %v2911_v4 = vsel %vm605_vm1, %v5402_v27, 0.0  ;;  %v2705_v10 = vmax.f32 %v2703_v42, %v2704_v9 }
 0x49f   : > { %v5410_v46 = vpop.eup %4096  ;;  %v3130_v22 = vsel %vm605_vm1, %v3042_v5, 0.0  ;;  %v3131_v41 = vsel %vm605_vm1, %v3043_v26, 0.0  ;;  %v2912_v24 = vadd.f32 %v2911_v4, %v2910_v15  ;;  %v3074_v2 = vrot.slane %v3073_v32, 1  ;;  %v5602_v26 = vld [vmem:[#allocation13_spill] sm:$0xff] }
 0x4a0   : > { %v5414_v12 = vpop.eup %4098  ;;  %v3132_v19 = vadd.f32 %v3131_v41, %v3130_v22  ;;  %v2899_v31 = vrot.slane %v2898_v20, 1  ;;  %v2906_v49 = vrot.slane %v2905_v48, 2  ;;  %v2919_v59 = vsel %vm605_vm1, %v5410_v46, 0.0 }
 0x4a1   : > { %v2913_v52 = vrot.slane %v2912_v24, 4  ;;  %v2920_v55 = vsel %vm605_vm1, %v5414_v12, 0.0  ;;  %v2736_v43 = vsub.f32 %v5348_v63, %v2705_v10  ;;  %v2737_v60 = vsub.f32 %v5323_v40, %v2705_v10 }
 0x4a2   : > { %v3133_v0 = vrot.slane %v3132_v19, 4  ;;  %v2900_v57 = vadd.f32 %v2899_v31, %v2898_v20  ;;  %v2907_v3 = vadd.f32 %v2906_v49, %v2905_v48  ;;  %v2921_v54 = vadd.f32 %v2920_v55, %v2919_v59 }
 0x4a3   : > { %v2914_v47 = vadd.f32 %v2913_v52, %v2912_v24  ;;  %v2798_v33 = vmul.f32 1.442695, %v2736_v43  ;;  %v2800_v42 = vmul.f32 1.442695, %v2737_v60  ;;  %v5422_v14 = vadd.f32 %v3074_v2, %v3073_v32 }
 0x4a4   : > { %v5424_v29 = vadd.f32 %v3133_v0, %v3132_v19  ;;  %4106 = vrcp.f32 %v2900_v57  ;;  %v2908_v38 = vrot.slane %v2907_v3, 1  ;;  %v2922_v18 = vrot.slane %v2921_v54, 4 }
 0x4a5   : > { %v4101_v50 = vpop.eup %4100  ;;  %v2915_v1 = vrot.slane %v2914_v47, 2  ;;  %4108 = vpow2.f32 %v2798_v33  ;;  %v3080_v40 = vadd.f32 %v3079_v45, %v5225_v58  ;;  %v3088_v63 = vrot.slane %v5239_v51, 4  ;;  %v5601_v58 = vld [vmem:[#allocation14_spill] sm:$0xff] }
 0x4a6   : > { %v5430_v53 = vpop.eup %4102  ;;  %v3135_v8 = vrot.slane %v5424_v29, 2  ;;  %v2980_v32 = vmul.f32 %v4101_v50, %v5338_v56  ;;  %v2981_v9 = vmul.f32 %v4101_v50, %v5340_v61  ;;  %v2909_v28 = vadd.f32 %v2908_v38, %v2907_v3 }
 0x4a7   : > { %v5435_v16 = vpop.eup %4104  ;;  %v2916_v44 = vadd.f32 %v2915_v1, %v2914_v47  ;;  %v2923_v5 = vadd.f32 %v2922_v18, %v2921_v54  ;;  %v2928_v37 = vsel %vm605_vm1, %v5430_v53, 0.0  ;;  %4110 = vpow2.f32 %v2800_v42 }
 0x4a8   : > { %v3044_v45 = vmul.f32 %v5601_v58, %v2980_v32  ;;  %v3045_v15 = vmul.f32 %v5602_v26, %v2981_v9  ;;  %4112 = vrcp.f32 %v2909_v28  ;;  %v2929_v20 = vsel %vm605_vm1, %v5435_v16, 0.0  ;;  %v5603_v32 = vld [vmem:[#allocation16_spill] sm:$0xff]  ;;  %v5604_v28 = vld [vmem:[#allocation15_spill] sm:$0xff] }
 0x4a9   : > { %v2917_v56 = vrot.slane %v2916_v44, 1  ;;  %v2924_v48 = vrot.slane %v2923_v5, 2  ;;  %v2930_v61 = vadd.f32 %v2929_v20, %v2928_v37  ;;  %v3081_v4 = vrot.slane %v3080_v40, 2 }
 0x4aa   : > { %v3139_v10 = vsel %vm605_vm1, %v3044_v45, 0.0  ;;  %v3140_v22 = vsel %vm605_vm1, %v3045_v15, 0.0  ;;  %v3089_v41 = vadd.f32 %v3088_v63, %v5239_v51  ;;  %v3095_v24 = vsel %vm605_vm1, %v5248_v62, 0.0 }
 0x4ab   : > { %v3141_v2 = vadd.f32 %v3140_v22, %v3139_v10  ;;  %v2918_v19 = vadd.f32 %v2917_v56, %v2916_v44  ;;  %v2925_v31 = vadd.f32 %v2924_v48, %v2923_v5  ;;  %v2931_v49 = vrot.slane %v2930_v61, 4  ;;  %v5605_v10 = vld [vmem:[#allocation18_spill] sm:$0xff] }
 0x4ac   : > { %v3082_v59 = vadd.f32 %v3081_v4, %v3080_v40  ;;  %v3090_v52 = vrot.slane %v3089_v41, 2  ;;  %v3096_v55 = vadd.f32 %v3095_v24, %v5263_v21  ;;  %v3103_v43 = vsel %vm605_vm1, %v5274_v6, 0.0 }
 0x4ad   : > { %v3142_v60 = vrot.slane %v3141_v2, 4  ;;  %4114 = vrcp.f32 %v2918_v19  ;;  %v2926_v0 = vrot.slane %v2925_v31, 1  ;;  %v2932_v57 = vadd.f32 %v2931_v49, %v2930_v61 }
 0x4ae   : > { %v4107_v3 = vpop.eup %4106  ;;  %v3083_v51 = vrot.slane %v3082_v59, 1  ;;  %v3091_v54 = vadd.f32 %v3090_v52, %v3089_v41  ;;  %v3097_v47 = vrot.slane %v3096_v55, 4  ;;  %v3104_v62 = vsel %vm605_vm1, %v5359_v35, 0.0  ;;  %v5606_v41 = vld [vmem:[#allocation17_spill] sm:$0xff] }
 0x4af   : > { %v5453_v33 = vpop.eup %4108  ;;  %v5455_v42 = vadd.f32 %v3142_v60, %v3141_v2  ;;  %v2982_v21 = vmul.f32 %v4107_v3, %v5361_v17  ;;  %v2983_v38 = vmul.f32 %v4107_v3, %v5363_v13  ;;  %v2927_v6 = vadd.f32 %v2926_v0, %v2925_v31 }
 0x4b0   : > { %v2933_v18 = vrot.slane %v2932_v57, 2  ;;  %v2937_v50 = vsel %vm605_vm1, %v5453_v33, 0.0  ;;  %v5461_v1 = vadd.f32 %v3083_v51, %v3082_v59  ;;  %v3092_v40 = vrot.slane %v3091_v54, 1 }
 0x4b1   : > { %v5463_v63 = vpop.eup %4110  ;;  %v3144_v35 = vrot.slane %v5455_v42, 2  ;;  %v3046_v9 = vmul.f32 %v5603_v32, %v2982_v21  ;;  %v3047_v44 = vmul.f32 %v5604_v28, %v2983_v38  ;;  %4116 = vrcp.f32 %v2927_v6  ;;  %v5607_v21 = vld [vmem:[#allocation20_spill] sm:$0xff]  ;;  %v5608_v6 = vld [vmem:[#allocation19_spill] sm:$0xff] }
 0x4b2   : > { %v4113_v17 = vpop.eup %4112  ;;  %v2934_v5 = vadd.f32 %v2933_v18, %v2932_v57  ;;  %v2938_v13 = vsel %vm605_vm1, %v5463_v63, 0.0  ;;  %v5470_v37 = vadd.f32 %v3092_v40, %v3091_v54  ;;  %v3098_v58 = vadd.f32 %v3097_v47, %v3096_v55 }
 0x4b3   : > { %v3148_v45 = vsel %vm605_vm1, %v3046_v9, 0.0  ;;  %v3149_v26 = vsel %vm605_vm1, %v3047_v44, 0.0  ;;  %v2984_v15 = vmul.f32 %v4113_v17, %v5377_v23  ;;  %v2985_v20 = vmul.f32 %v4113_v17, %v5388_v39 }
 0x4b4   : > { %v3150_v56 = vadd.f32 %v3149_v26, %v3148_v45  ;;  %v2935_v48 = vrot.slane %v2934_v5, 1  ;;  %v2939_v61 = vadd.f32 %v2938_v13, %v2937_v50  ;;  %v3099_v4 = vrot.slane %v3098_v58, 2  ;;  %v5609_v26 = vld [vmem:[#allocation22_spill] sm:$0xff] }
 0x4b5   : > { %v3048_v22 = vmul.f32 %v5605_v10, %v2984_v15  ;;  %v3049_v24 = vmul.f32 %v5606_v41, %v2985_v20  ;;  %v3105_v2 = vadd.f32 %v3104_v62, %v3103_v43  ;;  %v3112_v19 = vsel %vm605_vm1, %v5311_v25, 0.0  ;;  %v5610_v20 = vld [vmem:[#allocation21_spill] sm:$0xff] }
 0x4b6   : > { %v3151_v31 = vrot.slane %v3150_v56, 4  ;;  %v2936_v49 = vadd.f32 %v2935_v48, %v2934_v5  ;;  %v2940_v59 = vrot.slane %v2939_v61, 4  ;;  %v3100_v23 = vadd.f32 %v3099_v4, %v3098_v58 }
 0x4b7   : > { %v4115_v52 = vpop.eup %4114  ;;  %v3157_v39 = vsel %vm605_vm1, %v3048_v22, 0.0  ;;  %v3158_v55 = vsel %vm605_vm1, %v3049_v24, 0.0  ;;  %v3106_v60 = vrot.slane %v3105_v2, 4  ;;  %v3113_v0 = vsel %vm605_vm1, %v5369_v30, 0.0 }
 0x4b8   : > { %v5484_v57 = vadd.f32 %v3151_v31, %v3150_v56  ;;  %v3159_v43 = vadd.f32 %v3158_v55, %v3157_v39  ;;  %v2986_v3 = vmul.f32 %v4115_v52, %v5398_v11  ;;  %v2987_v25 = vmul.f32 %v4115_v52, %v5402_v27 }
 0x4b9   : > { %4118 = vrcp.f32 %v2936_v49  ;;  %v2941_v51 = vadd.f32 %v2940_v59, %v2939_v61  ;;  %v3101_v54 = vrot.slane %v3100_v23, 1  ;;  %v3107_v47 = vadd.f32 %v3106_v60, %v3105_v2 }
 0x4ba   : > { %v3160_v62 = vrot.slane %v3159_v43, 4  ;;  %v3050_v38 = vmul.f32 %v5607_v21, %v2986_v3  ;;  %v3051_v18 = vmul.f32 %v5608_v6, %v2987_v25  ;;  %v3114_v50 = vadd.f32 %v3113_v0, %v3112_v19  ;;  %v5611_v0 = vld [vmem:[#allocation24_spill] sm:$0xff]  ;;  %v5612_v25 = vld [vmem:[#allocation23_spill] sm:$0xff] }
 0x4bb   : > { %v4117_v40 = vpop.eup %4116  ;;  %v2942_v32 = vrot.slane %v2941_v51, 2  ;;  %v3102_v30 = vadd.f32 %v3101_v54, %v3100_v23  ;;  %v3108_v9 = vrot.slane %v3107_v47, 2  ;;  %v3121_v28 = vsel %vm605_vm1, %v5375_v7, 0.0 }
 0x4bc   : > { %v3166_v11 = vsel %vm605_vm1, %v3050_v38, 0.0  ;;  %v3167_v27 = vsel %vm605_vm1, %v3051_v18, 0.0  ;;  %v2988_v44 = vmul.f32 %v4117_v40, %v5410_v46  ;;  %v2989_v17 = vmul.f32 %v4117_v40, %v5414_v12 }
 0x4bd   : > { %v3168_v5 = vadd.f32 %v3167_v27, %v3166_v11  ;;  %v2943_v13 = vadd.f32 %v2942_v32, %v2941_v51  ;;  %v3109_v58 = vadd.f32 %v3108_v9, %v3107_v47  ;;  %v3115_v45 = vrot.slane %v3114_v50, 4 }
 0x4be   : > { %v3052_v15 = vmul.f32 %v5609_v26, %v2988_v44  ;;  %v3053_v56 = vmul.f32 %v5610_v20, %v2989_v17  ;;  %v3122_v48 = vsel %vm605_vm1, %v5380_v34, 0.0  ;;  %v3219_v7 = vsel %vm3218_vm4, %v5422_v14, %v5400_v36  ;;  %v5613_v26 = vld [vmem:[#allocation5_spill] sm:$0xff] }
 0x4bf   : > { %v2944_v61 = vrot.slane %v2943_v13, 1  ;;  %v3110_v4 = vrot.slane %v3109_v58, 1  ;;  %v3116_v46 = vadd.f32 %v3115_v45, %v3114_v50  ;;  %v3123_v10 = vadd.f32 %v3122_v48, %v3121_v28  ;;  %v4122_v45 = vld [vmem:[#allocation3 + $0x8] sm:$0xff]  ;;  %v4123_v20 = vld [vmem:[#allocation3] sm:$0xff] }
 0x4c0   : > { %v3175_v12 = vsel %vm605_vm1, %v3052_v15, 0.0  ;;  %v3221_v22 = vsel %vm3220_vm5, %v5461_v1, %v3219_v7  ;;  %v3136_v52 = vadd.f32 %v3135_v8, %v5424_v29  ;;  %v3145_v55 = vadd.f32 %v3144_v35, %v5455_v42 }
 0x4c1   : > { %v2945_v41 = vadd.f32 %v2944_v61, %v2943_v13  ;;  %v3111_v24 = vadd.f32 %v3110_v4, %v3109_v58  ;;  %v3117_v2 = vrot.slane %v3116_v46, 2  ;;  %v3124_v19 = vrot.slane %v3123_v10, 4 }
 0x4c2   : > { %v3223_v34 = vsel %vm3222_vm6, %v5470_v37, %v3221_v22  ;;  %v3153_v60 = vrot.slane %v5484_v57, 2  ;;  %v3137_v51 = vrot.slane %v3136_v52, 1  ;;  %v3146_v21 = vrot.slane %v3145_v55, 1 }
 0x4c3   : > { %v4119_v36 = vpop.eup %4118  ;;  %4120 = vrcp.f32 %v2945_v41  ;;  %v3118_v14 = vadd.f32 %v3117_v2, %v3116_v46  ;;  %v3125_v31 = vadd.f32 %v3124_v19, %v3123_v10  ;;  %v3225_v49 = vsel %vm3224_vm7, %v3102_v30, %v3223_v34 }
 0x4c4   : > { %v2990_v1 = vmul.f32 %v4119_v36, %v5430_v53  ;;  %v2991_v59 = vmul.f32 %v4119_v36, %v5435_v16  ;;  %v3227_v23 = vsel %vm3226_vm8, %v3111_v24, %v3225_v49  ;;  %v3161_v16 = vadd.f32 %v3160_v62, %v3159_v43 }
 0x4c5   : > { %v3119_v37 = vrot.slane %v3118_v14, 1  ;;  %v3126_v39 = vrot.slane %v3125_v31, 2  ;;  %v3154_v38 = vadd.f32 %v3153_v60, %v5484_v57  ;;  %v3138_v29 = vadd.f32 %v3137_v51, %v3136_v52 }
 0x4c6   : > { %v3054_v3 = vmul.f32 %v5611_v0, %v2990_v1  ;;  %v3055_v53 = vmul.f32 %v5612_v25, %v2991_v59  ;;  %v3162_v8 = vrot.slane %v3161_v16, 2  ;;  %v3169_v6 = vrot.slane %v3168_v5, 4 }
 0x4c7   : > { %v3120_v54 = vadd.f32 %v3119_v37, %v3118_v14  ;;  %v3127_v47 = vadd.f32 %v3126_v39, %v3125_v31  ;;  %v3176_v18 = vsel %vm605_vm1, %v3053_v56, 0.0  ;;  %v3147_v35 = vadd.f32 %v3146_v21, %v3145_v55  ;;  %v5614_v56 = vld [vmem:[#allocation6_spill] sm:$0xff] }
 0x4c8   : > { %v3155_v40 = vrot.slane %v3154_v38, 1  ;;  %v3163_v32 = vadd.f32 %v3162_v8, %v3161_v16  ;;  %v3170_v30 = vadd.f32 %v3169_v6, %v3168_v5  ;;  %v3177_v9 = vadd.f32 %v3176_v18, %v3175_v12 }
 0x4c9   : > { %v3128_v50 = vrot.slane %v3127_v47, 1  ;;  %v3229_v42 = vsel %vm3228_vm9, %v3120_v54, %v3227_v23  ;;  %v3184_v43 = vsel %vm605_vm1, %v3054_v3, 0.0  ;;  %v3185_v11 = vsel %vm605_vm1, %v3055_v53, 0.0 }
 0x4ca   : > { %v3156_v28 = vadd.f32 %v3155_v40, %v3154_v38  ;;  %v3232_v57 = vsel %vm3218_vm4, %v3147_v35, %v3138_v29  ;;  %v3164_v27 = vrot.slane %v3163_v32, 1  ;;  %v3171_v44 = vrot.slane %v3170_v30, 2 }
 0x4cb   : > { %v3129_v62 = vadd.f32 %v3128_v50, %v3127_v47  ;;  %v3178_v17 = vrot.slane %v3177_v9, 4  ;;  %v3186_v13 = vadd.f32 %v3185_v11, %v3184_v43  ;;  %v3025_v15 = vadd.f32 %v4122_v45, %v5613_v26 }
 0x4cc   : > { %v3024_v5 = vadd.f32 %v4123_v20, %v5614_v56  ;;  %v3233_v7 = vsel %vm3220_vm5, %v3156_v28, %v3232_v57  ;;  %v3165_v46 = vadd.f32 %v3164_v27, %v3163_v32  ;;  %v3172_v10 = vadd.f32 %v3171_v44, %v3170_v30 }
 0x4cd   : > { %v4121_v58 = vpop.eup %4120  ;;  %v3231_v48 = vsel %vm3230_vm10, %v3129_v62, %v3229_v42  ;;  %v3179_v12 = vadd.f32 %v3178_v17, %v3177_v9  ;;  %v3187_v22 = vrot.slane %v3186_v13, 4 }
 0x4ce   : > { %v2992_v61 = vmul.f32 %v4121_v58, %v5453_v33  ;;  %v2993_v4 = vmul.f32 %v4121_v58, %v5463_v63  ;;  %3241 = vxpose.xlu0.b32.start [1/2] (short) (narrow) %v3231_v48, 32  ;;  %v3173_v2 = vrot.slane %v3172_v10, 1  ;;  %v3234_v19 = vsel %vm3222_vm6, %v3165_v46, %v3233_v7 }
 0x4cf   : > { %v3180_v34 = vrot.slane %v3179_v12, 2  ;;  %v3188_v36 = vadd.f32 %v3187_v22, %v3186_v13 }
 0x4d0   : > { %v3056_v41 = vmul.f32 %v3024_v5, %v2992_v61  ;;  %v3057_v24 = vmul.f32 %v3025_v15, %v2993_v4  ;;  %v3174_v14 = vadd.f32 %v3173_v2, %v3172_v10 }
 0x4d1   : > { %v3181_v33 = vadd.f32 %v3180_v34, %v3179_v12  ;;  %v3189_v1 = vrot.slane %v3188_v36, 2 }
 0x4d2   : > { %v3193_v31 = vsel %vm605_vm1, %v3056_v41, 0.0  ;;  %v3194_v49 = vsel %vm605_vm1, %v3057_v24, 0.0  ;;  %v3235_v59 = vsel %vm3224_vm7, %v3174_v14, %v3234_v19 }
 0x4d3   : > { %v3195_v63 = vadd.f32 %v3194_v49, %v3193_v31  ;;  %v3182_v23 = vrot.slane %v3181_v33, 1  ;;  %v3190_v52 = vadd.f32 %v3189_v1, %v3188_v36 }
 0x4d5   : > { %v3196_v37 = vrot.slane %v3195_v63, 4  ;;  %v3183_v39 = vadd.f32 %v3182_v23, %v3181_v33  ;;  %v3191_v55 = vrot.slane %v3190_v52, 1 }
 0x4d7   : > { %v3197_v60 = vadd.f32 %v3196_v37, %v3195_v63  ;;  %v3192_v0 = vadd.f32 %v3191_v55, %v3190_v52  ;;  %v3236_v25 = vsel %vm3226_vm8, %v3183_v39, %v3235_v59 }
 0x4d9   : > { %v3198_v3 = vrot.slane %v3197_v60, 2  ;;  %v3237_v51 = vsel %vm3228_vm9, %v3192_v0, %v3236_v25 }
 0x4db   : > { %v3199_v53 = vadd.f32 %v3198_v3, %v3197_v60 }
 0x4dd   : > { %v3200_v16 = vrot.slane %v3199_v53, 1 }
 0x4df   : > { %v3201_v54 = vadd.f32 %v3200_v16, %v3199_v53 }
 0x4e1   : > { %v3238_v47 = vsel %vm3230_vm10, %v3201_v54, %v3237_v51 }
 0x4e2   : > { %3242 = vxpose.xlu0.b32.end [2/2] (short) (narrow) %v3238_v47, 32 }
 0x55e   : > { %v3257_v21 = vpop.trf.xlu0 }
 0x55f   : > { %3274 = vst.msk [vmem:[%s544_s16] sm:$0xff] %vm3273_vm11, %v3257_v21 }
 0x562   : > { %v3258_v38 = vpop.trf.xlu0 }
 0x563   : > { %3275 = vst.msk [vmem:[%s544_s16 + $0x8] sm:$0xff] %vm3273_vm11, %v3258_v38 }
 0x566   : > { %v3259_v29 = vpop.trf.xlu0 }
 0x567   : > { %3276 = vst.msk [vmem:[%s544_s16 + $0x10] sm:$0xff] %vm3273_vm11, %v3259_v29 }
 0x56a   : > { %v3260_v8 = vpop.trf.xlu0 }
 0x56b   : > { %3277 = vst.msk [vmem:[%s544_s16 + $0x18] sm:$0xff] %vm3273_vm11, %v3260_v8 }
 0x56c PF: > { %s23_s27 = sadd.s32 1, %s4146_s27   ;;  %s5615_s25 = smov %s4142_s26 }
 0x56d   : > { %p20_p5 = scmp.ge.s32.totalorder %s23_s27, 4   ;;  %s5616_s26 = smov %s5618_s28 }
 0x56f   :  { %22 = sbr.rel (!%p20_p5) target bundleno = 2 (0x2), region = 115 }

</bundles_post_ra>
